<compile_context>
chip_gen: v7x
topology: tpu7x:2x2x1
jax: 0.10.0
libtpu: 0.0.40
codegen_flags: <defaults>
</compile_context>

<pallas_src>
import jax
import jax.numpy as jnp
from jax import lax
from jax.experimental import pallas as pl
from jax.experimental.pallas import tpu as pltpu


def conv3d_kernel(x_ref, w_ref, b_ref, y_ref, stats_ref):
    """Direct 3x3x3 conv (stride 1, pad 1) for one (batch n, depth-tile dt) output slab.

    x_ref:     (1, Dp, Hp, Wp*Cin)   bf16 padded input for batch n (resident across dt)
    w_ref:     (9*Wp*Cin, W*Cout)    bf16 banded weights (kd, kh, W-tap folded into K / output cols)
    b_ref:     (1, W*Cout)           f32 conv bias, tiled over w
    y_ref:     (1, TD, H, W*Cout)    f32 conv output tile (pre-BN), lane-dense
    stats_ref: (1, 2, W*Cout)        f32 per-n partial [sum, sum_sq] over (d, h) (w kept on lanes)
    """
    dt = pl.program_id(1)
    _, TD, H, WC = y_ref.shape
    K9 = w_ref.shape[0]
    d0 = pl.multiple_of(dt * TD, TD)

    # im2col: 9 (kd, kh) taps; depth offset is dynamic, height offset is a static sublane shift.
    taps = [x_ref[0, pl.ds(d0 + kd, TD), pl.ds(kh, H), :]
            for kd in range(3) for kh in range(3)]
    patch = jnp.concatenate(taps, axis=-1).reshape(TD * H, K9)         # (TD*H, 9*Wp*Cin) bf16

    # Single MXU matmul straight into (rows, W*Cout) lane-dense layout, f32 accumulation.
    acc = jnp.dot(patch, w_ref[...], preferred_element_type=jnp.float32)
    yb = acc + b_ref[...]                                              # bias broadcasts over rows
    y_ref[...] = yb.reshape(1, TD, H, WC)

    # Per-n BN batch statistics accumulated across depth tiles (race-free per n, so the n grid
    # axis can be "parallel"). Reduced to per-channel stats in the wrapper.
    @pl.when(dt == 0)
    def _():
        stats_ref[...] = jnp.zeros_like(stats_ref)

    stats_ref[0, 0:1, :] += jnp.sum(yb, axis=0)[None, :]
    stats_ref[0, 1:2, :] += jnp.sum(yb * yb, axis=0)[None, :]


def bn_relu_kernel(y_ref, scale_ref, shift_ref, o_ref):
    """Fused affine-normalize + ReLU on a lane-dense (TB, W*Cout) row tile."""
    o_ref[...] = jnp.maximum(y_ref[...] * scale_ref[...] + shift_ref[...], 0.0)


def conv3d_block_forward(x_ncdhw, w_oidhw, b, gamma, beta, eps=1e-5):
    """Equivalent of Conv3DBlock.forward(x) with BatchNorm in training mode (batch stats)."""
    N, Cin, D, H, W = x_ncdhw.shape
    Cout = w_oidhw.shape[0]
    Dp, Hp, Wp = D + 2, H + 2, W + 2
    WC = W * Cout                      # flattened (w, cout) lane axis (128 here -> lane-dense)
    K9 = 9 * Wp * Cin                  # single-matmul contraction size
    td = next(t for t in (8, 4, 2, 1) if D % t == 0)
    nd = D // td

    # NCDHW -> NDHWC, zero-pad spatial dims by 1, flatten (Wp, Cin) onto the lane axis, bf16.
    x = jnp.transpose(x_ncdhw, (0, 2, 3, 4, 1)).astype(jnp.float32)
    xp = jnp.pad(x, ((0, 0), (1, 1), (1, 1), (1, 1), (0, 0)))
    xp = xp.reshape(N, Dp, Hp, Wp * Cin).astype(jnp.bfloat16)

    # PyTorch conv weight (Cout, Cin, kd, kh, kw) -> banded matrix folding the W axis into the
    # matmul output columns:  Bw[(kd, kh, wp, ci), (w, co)] = wk[kd, kh, wp - w, ci, co]
    # for 0 <= wp - w <= 2, else 0.
    wk = jnp.transpose(w_oidhw, (2, 3, 4, 1, 0)).astype(jnp.float32)   # (3,3,3,Cin,Cout)
    cols = [jnp.pad(wk, ((0, 0), (0, 0), (w, Wp - 3 - w), (0, 0), (0, 0))) for w in range(W)]
    Bw = jnp.stack(cols, axis=-2)                                      # (3,3,Wp,Cin,W,Cout)
    Bw = Bw.reshape(K9, WC).astype(jnp.bfloat16)

    b_t = jnp.tile(b.astype(jnp.float32), W).reshape(1, WC)            # (w, co) layout

    y, stats = pl.pallas_call(
        conv3d_kernel,
        grid=(N, nd),
        in_specs=[
            pl.BlockSpec((1, Dp, Hp, Wp * Cin), lambda n, d: (n, 0, 0, 0)),
            pl.BlockSpec((K9, WC), lambda n, d: (0, 0)),
            pl.BlockSpec((1, WC), lambda n, d: (0, 0)),
        ],
        out_specs=(
            pl.BlockSpec((1, td, H, WC), lambda n, d: (n, d, 0, 0)),
            pl.BlockSpec((1, 2, WC), lambda n, d: (n, 0, 0)),
        ),
        out_shape=(
            jax.ShapeDtypeStruct((N, D, H, WC), jnp.float32),
            jax.ShapeDtypeStruct((N, 2, WC), jnp.float32),
        ),
        compiler_params=pltpu.CompilerParams(
            dimension_semantics=("parallel", "arbitrary"),
            vmem_limit_bytes=64 * 1024 * 1024),
    )(xp, Bw, b_t)

    # BN (training mode): biased batch variance from f32 partial sums, reduced in the wrapper.
    # TODO(synk): BatchNorm running_mean/running_var (momentum) buffer update is module state
    # only and is not materialized; the forward output is unaffected.
    Mtot = N * D * H * W
    st = stats.reshape(N, 2, W, Cout)
    mean = jnp.sum(st[:, 0], axis=(0, 1)) / Mtot
    var = jnp.maximum(jnp.sum(st[:, 1], axis=(0, 1)) / Mtot - mean * mean, 0.0)
    inv_std = lax.rsqrt(var + eps)
    scale = gamma.astype(jnp.float32) * inv_std
    shift = beta.astype(jnp.float32) - mean * scale
    scale_t = jnp.tile(scale, W).reshape(1, WC)
    shift_t = jnp.tile(shift, W).reshape(1, WC)

    # BN + ReLU on a flat 2D view with large lane-dense row tiles.
    rows = N * D * H
    tb = next(t for t in (1024, 512, 256, 128, 64, 32, 16, 8, rows) if rows % t == 0)
    y2 = y.reshape(rows, WC)
    out2 = pl.pallas_call(
        bn_relu_kernel,
        grid=(rows // tb,),
        in_specs=[
            pl.BlockSpec((tb, WC), lambda i: (i, 0)),
            pl.BlockSpec((1, WC), lambda i: (0, 0)),
            pl.BlockSpec((1, WC), lambda i: (0, 0)),
        ],
        out_specs=pl.BlockSpec((tb, WC), lambda i: (i, 0)),
        out_shape=jax.ShapeDtypeStruct((rows, WC), jnp.float32),
        compiler_params=pltpu.CompilerParams(
            dimension_semantics=("parallel",)),
    )(y2, scale_t, shift_t)

    # (N*D*H, W*Cout) -> (N, D, H, W, Cout) -> NCDHW (PyTorch convention).
    out = out2.reshape(N, D, H, W, Cout)
    return jnp.transpose(out, (0, 4, 1, 2, 3))


def reference_forward(x, w, b, gamma, beta, eps=1e-5):
    """Pure-JAX f32 reference (lax conv + batch-stat BN + ReLU) in NCDHW."""
    dn = lax.conv_dimension_numbers(x.shape, w.shape, ("NCDHW", "OIDHW", "NCDHW"))
    y = lax.conv_general_dilated(x, w, (1, 1, 1), [(1, 1)] * 3, dimension_numbers=dn)
    y = y + b.reshape(1, -1, 1, 1, 1)
    mean = jnp.mean(y, axis=(0, 2, 3, 4), keepdims=True)
    var = jnp.mean((y - mean) ** 2, axis=(0, 2, 3, 4), keepdims=True)
    yh = (y - mean) * lax.rsqrt(var + eps)
    return jnp.maximum(yh * gamma.reshape(1, -1, 1, 1, 1)
                       + beta.reshape(1, -1, 1, 1, 1), 0.0)


if __name__ == "__main__":
    N, Cin, Cout = 2, 4, 8
    D, H, W = 8, 16, 16            # W * Cout = 128 -> lane-dense output blocks

    key = jax.random.PRNGKey(0)
    k1, k2, k3, k4, k5 = jax.random.split(key, 5)
    # Deterministic synthetic parameters (shapes per nn.Conv3d / nn.BatchNorm3d).
    w = jax.random.normal(k1, (Cout, Cin, 3, 3, 3), jnp.float32) * 0.1   # OIDHW
    b = jax.random.normal(k2, (Cout,), jnp.float32) * 0.1
    gamma = 1.0 + 0.1 * jax.random.normal(k3, (Cout,), jnp.float32)
    beta = 0.1 * jax.random.normal(k4, (Cout,), jnp.float32)
    x = jax.random.normal(k5, (N, Cin, D, H, W), jnp.float32)            # NCDHW

    out = conv3d_block_forward(x, w, b, gamma, beta)
    out = jax.block_until_ready(out)

    ref = reference_forward(x, w, b, gamma, beta)
    assert out.shape == ref.shape == (N, Cout, D, H, W)
    # Kernel feeds the MXU in bf16 (f32 accumulation), so compare at bf16-level tolerance.
    max_err = float(jnp.max(jnp.abs(out - ref)))
    assert jnp.allclose(out, ref, atol=3e-2, rtol=3e-2), f"mismatch vs reference (max abs err {max_err})"

    print("KERNEL_OK")
</pallas_src>

<mosaic_0001>
module attributes {stable_mosaic.version = 11 : i64} {
  func.func @conv3d_kernel(%arg0: i32, %arg1: i32, %arg2: memref<1x10x18x72xbf16, #tpu.memory_space<vmem>>, %arg3: memref<648x128xbf16, #tpu.memory_space<vmem>>, %arg4: memref<1x128xf32, #tpu.memory_space<vmem>>, %arg5: memref<1x8x16x128xf32, #tpu.memory_space<vmem>>, %arg6: memref<1x2x128xf32, #tpu.memory_space<vmem>>) attributes {dimension_semantics = [#tpu.dimension_semantics<parallel>, #tpu.dimension_semantics<arbitrary>], iteration_bounds = array<i64: 2, 1>, scalar_prefetch = 0 : i64, scratch_operands = 0 : i64, tpu.core_type = #tpu.core_type<tc>, window_params = [{transform_indices = @transform_0, window_bounds = array<i64: 1, 10, 18, 72>}, {pipeline_mode = #tpu.pipeline_mode<synchronous>, transform_indices = @transform_1, window_bounds = array<i64: 648, 128>}, {pipeline_mode = #tpu.pipeline_mode<synchronous>, transform_indices = @transform_2, window_bounds = array<i64: 1, 128>}, {transform_indices = @transform_3, window_bounds = array<i64: 1, 8, 16, 128>}, {transform_indices = @transform_4, window_bounds = array<i64: 1, 2, 128>}]} {
    %c8_i32 = arith.constant 8 : i32
    %0 = arith.muli %arg1, %c8_i32 : i32
    %1 = tpu.assume_multiple %0, 8 : i32
    %c0_i32 = arith.constant 0 : i32
    %2 = arith.addi %1, %c0_i32 : i32
    %c0 = arith.constant 0 : index
    %3 = arith.index_cast %2 : i32 to index
    %c0_0 = arith.constant 0 : index
    %c0_1 = arith.constant 0 : index
    %4 = vector.load %arg2[%c0, %3, %c0_0, %c0_1] : memref<1x10x18x72xbf16, #tpu.memory_space<vmem>>, vector<1x8x16x72xbf16>
    %5 = vector.shape_cast %4 : vector<1x8x16x72xbf16> to vector<8x16x72xbf16>
    %c0_i32_2 = arith.constant 0 : i32
    %6 = arith.addi %1, %c0_i32_2 : i32
    %c0_3 = arith.constant 0 : index
    %7 = arith.index_cast %6 : i32 to index
    %c1 = arith.constant 1 : index
    %c0_4 = arith.constant 0 : index
    %8 = vector.load %arg2[%c0_3, %7, %c1, %c0_4] : memref<1x10x18x72xbf16, #tpu.memory_space<vmem>>, vector<1x8x16x72xbf16>
    %9 = vector.shape_cast %8 : vector<1x8x16x72xbf16> to vector<8x16x72xbf16>
    %c0_i32_5 = arith.constant 0 : i32
    %10 = arith.addi %1, %c0_i32_5 : i32
    %c0_6 = arith.constant 0 : index
    %11 = arith.index_cast %10 : i32 to index
    %c2 = arith.constant 2 : index
    %c0_7 = arith.constant 0 : index
    %12 = vector.load %arg2[%c0_6, %11, %c2, %c0_7] : memref<1x10x18x72xbf16, #tpu.memory_space<vmem>>, vector<1x8x16x72xbf16>
    %13 = vector.shape_cast %12 : vector<1x8x16x72xbf16> to vector<8x16x72xbf16>
    %c1_i32 = arith.constant 1 : i32
    %14 = arith.addi %1, %c1_i32 : i32
    %c0_8 = arith.constant 0 : index
    %15 = arith.index_cast %14 : i32 to index
    %c0_9 = arith.constant 0 : index
    %c0_10 = arith.constant 0 : index
    %16 = vector.load %arg2[%c0_8, %15, %c0_9, %c0_10] : memref<1x10x18x72xbf16, #tpu.memory_space<vmem>>, vector<1x8x16x72xbf16>
    %17 = vector.shape_cast %16 : vector<1x8x16x72xbf16> to vector<8x16x72xbf16>
    %c1_i32_11 = arith.constant 1 : i32
    %18 = arith.addi %1, %c1_i32_11 : i32
    %c0_12 = arith.constant 0 : index
    %19 = arith.index_cast %18 : i32 to index
    %c1_13 = arith.constant 1 : index
    %c0_14 = arith.constant 0 : index
    %20 = vector.load %arg2[%c0_12, %19, %c1_13, %c0_14] : memref<1x10x18x72xbf16, #tpu.memory_space<vmem>>, vector<1x8x16x72xbf16>
    %21 = vector.shape_cast %20 : vector<1x8x16x72xbf16> to vector<8x16x72xbf16>
    %c1_i32_15 = arith.constant 1 : i32
    %22 = arith.addi %1, %c1_i32_15 : i32
    %c0_16 = arith.constant 0 : index
    %23 = arith.index_cast %22 : i32 to index
    %c2_17 = arith.constant 2 : index
    %c0_18 = arith.constant 0 : index
    %24 = vector.load %arg2[%c0_16, %23, %c2_17, %c0_18] : memref<1x10x18x72xbf16, #tpu.memory_space<vmem>>, vector<1x8x16x72xbf16>
    %25 = vector.shape_cast %24 : vector<1x8x16x72xbf16> to vector<8x16x72xbf16>
    %c2_i32 = arith.constant 2 : i32
    %26 = arith.addi %1, %c2_i32 : i32
    %c0_19 = arith.constant 0 : index
    %27 = arith.index_cast %26 : i32 to index
    %c0_20 = arith.constant 0 : index
    %c0_21 = arith.constant 0 : index
    %28 = vector.load %arg2[%c0_19, %27, %c0_20, %c0_21] : memref<1x10x18x72xbf16, #tpu.memory_space<vmem>>, vector<1x8x16x72xbf16>
    %29 = vector.shape_cast %28 : vector<1x8x16x72xbf16> to vector<8x16x72xbf16>
    %c2_i32_22 = arith.constant 2 : i32
    %30 = arith.addi %1, %c2_i32_22 : i32
    %c0_23 = arith.constant 0 : index
    %31 = arith.index_cast %30 : i32 to index
    %c1_24 = arith.constant 1 : index
    %c0_25 = arith.constant 0 : index
    %32 = vector.load %arg2[%c0_23, %31, %c1_24, %c0_25] : memref<1x10x18x72xbf16, #tpu.memory_space<vmem>>, vector<1x8x16x72xbf16>
    %33 = vector.shape_cast %32 : vector<1x8x16x72xbf16> to vector<8x16x72xbf16>
    %c2_i32_26 = arith.constant 2 : i32
    %34 = arith.addi %1, %c2_i32_26 : i32
    %c0_27 = arith.constant 0 : index
    %35 = arith.index_cast %34 : i32 to index
    %c2_28 = arith.constant 2 : index
    %c0_29 = arith.constant 0 : index
    %36 = vector.load %arg2[%c0_27, %35, %c2_28, %c0_29] : memref<1x10x18x72xbf16, #tpu.memory_space<vmem>>, vector<1x8x16x72xbf16>
    %37 = vector.shape_cast %36 : vector<1x8x16x72xbf16> to vector<8x16x72xbf16>
    %38 = tpu.concatenate %5, %9, %13, %17, %21, %25, %29, %33, %37 in 2 : vector<8x16x72xbf16>, vector<8x16x72xbf16>, vector<8x16x72xbf16>, vector<8x16x72xbf16>, vector<8x16x72xbf16>, vector<8x16x72xbf16>, vector<8x16x72xbf16>, vector<8x16x72xbf16>, vector<8x16x72xbf16> -> vector<8x16x648xbf16>
    %39 = vector.shape_cast %38 : vector<8x16x648xbf16> to vector<128x648xbf16>
    %c0_30 = arith.constant 0 : index
    %c0_31 = arith.constant 0 : index
    %40 = vector.load %arg3[%c0_30, %c0_31] : memref<648x128xbf16, #tpu.memory_space<vmem>>, vector<648x128xbf16>
    %cst = arith.constant dense<0.000000e+00> : vector<128x128xf32>
    %41 = tpu.matmul %39, %40, %cst {dimension_numbers = #tpu.dot_dimension_numbers<[1], [0], [0], [1], [0, 0, 1, 1], [], []>} : vector<128x648xbf16>, vector<648x128xbf16>, vector<128x128xf32> -> vector<128x128xf32>
    %c0_32 = arith.constant 0 : index
    %c0_33 = arith.constant 0 : index
    %42 = vector.load %arg4[%c0_32, %c0_33] : memref<1x128xf32, #tpu.memory_space<vmem>>, vector<1x128xf32>
    %43 = vector.broadcast %42 : vector<1x128xf32> to vector<128x128xf32>
    %44 = arith.addf %41, %43 : vector<128x128xf32>
    %45 = vector.shape_cast %44 : vector<128x128xf32> to vector<1x8x16x128xf32>
    %c0_34 = arith.constant 0 : index
    %c0_35 = arith.constant 0 : index
    %c0_36 = arith.constant 0 : index
    %c0_37 = arith.constant 0 : index
    %46 = vector.load %arg5[%c0_34, %c0_35, %c0_36, %c0_37] : memref<1x8x16x128xf32, #tpu.memory_space<vmem>>, vector<1x8x16x128xf32>
    tpu.vector_store %arg5[%c0_34, %c0_35, %c0_36, %c0_37], %45 {strides = array<i32>} : memref<1x8x16x128xf32, #tpu.memory_space<vmem>>, vector<1x8x16x128xf32>,
    %c0_i32_38 = arith.constant 0 : i32
    %47 = arith.cmpi eq, %arg1, %c0_i32_38 : i32
    %48 = arith.extui %47 : i1 to i32
    %c0_i32_39 = arith.constant 0 : i32
    %49 = arith.cmpi ne, %48, %c0_i32_39 : i32
    scf.if %49 {
      %cst_54 = arith.constant 0.000000e+00 : f32
      %67 = vector.broadcast %cst_54 : f32 to vector<1x2x128xf32>
      %c0_55 = arith.constant 0 : index
      %c0_56 = arith.constant 0 : index
      %c0_57 = arith.constant 0 : index
      %68 = vector.load %arg6[%c0_55, %c0_56, %c0_57] : memref<1x2x128xf32, #tpu.memory_space<vmem>>, vector<1x2x128xf32>
      tpu.vector_store %arg6[%c0_55, %c0_56, %c0_57], %67 {strides = array<i32>} : memref<1x2x128xf32, #tpu.memory_space<vmem>>, vector<1x2x128xf32>,
    } else {
    }
    %c0_40 = arith.constant 0 : index
    %c0_41 = arith.constant 0 : index
    %c0_42 = arith.constant 0 : index
    %50 = vector.load %arg6[%c0_40, %c0_41, %c0_42] : memref<1x2x128xf32, #tpu.memory_space<vmem>>, vector<1x1x128xf32>
    %51 = vector.shape_cast %50 : vector<1x1x128xf32> to vector<1x128xf32>
    %cst_43 = arith.constant dense<0.000000e+00> : vector<128xf32>
    %52 = vector.multi_reduction <add>, %44, %cst_43 [0] : vector<128x128xf32> to vector<128xf32>
    %53 = vector.shape_cast %52 : vector<128xf32> to vector<1x128xf32>
    %54 = arith.addf %51, %53 : vector<1x128xf32>
    %c0_44 = arith.constant 0 : index
    %c0_45 = arith.constant 0 : index
    %c0_46 = arith.constant 0 : index
    %55 = vector.load %arg6[%c0_44, %c0_45, %c0_46] : memref<1x2x128xf32, #tpu.memory_space<vmem>>, vector<1x1x128xf32>
    %56 = vector.shape_cast %55 : vector<1x1x128xf32> to vector<1x128xf32>
    %57 = vector.shape_cast %54 : vector<1x128xf32> to vector<1x1x128xf32>
    tpu.vector_store %arg6[%c0_44, %c0_45, %c0_46], %57 {strides = array<i32>} : memref<1x2x128xf32, #tpu.memory_space<vmem>>, vector<1x1x128xf32>,
    %c0_47 = arith.constant 0 : index
    %c1_48 = arith.constant 1 : index
    %c0_49 = arith.constant 0 : index
    %58 = vector.load %arg6[%c0_47, %c1_48, %c0_49] : memref<1x2x128xf32, #tpu.memory_space<vmem>>, vector<1x1x128xf32>
    %59 = vector.shape_cast %58 : vector<1x1x128xf32> to vector<1x128xf32>
    %60 = arith.mulf %44, %44 : vector<128x128xf32>
    %cst_50 = arith.constant dense<0.000000e+00> : vector<128xf32>
    %61 = vector.multi_reduction <add>, %60, %cst_50 [0] : vector<128x128xf32> to vector<128xf32>
    %62 = vector.shape_cast %61 : vector<128xf32> to vector<1x128xf32>
    %63 = arith.addf %59, %62 : vector<1x128xf32>
    %c0_51 = arith.constant 0 : index
    %c1_52 = arith.constant 1 : index
    %c0_53 = arith.constant 0 : index
    %64 = vector.load %arg6[%c0_51, %c1_52, %c0_53] : memref<1x2x128xf32, #tpu.memory_space<vmem>>, vector<1x1x128xf32>
    %65 = vector.shape_cast %64 : vector<1x1x128xf32> to vector<1x128xf32>
    %66 = vector.shape_cast %63 : vector<1x128xf32> to vector<1x1x128xf32>
    tpu.vector_store %arg6[%c0_51, %c1_52, %c0_53], %66 {strides = array<i32>} : memref<1x2x128xf32, #tpu.memory_space<vmem>>, vector<1x1x128xf32>,
    return
  }
  func.func @transform_0(%arg0: i32, %arg1: i32) -> (i32, i32, i32, i32) {
    %c0_i32 = arith.constant 0 : i32
    %c0_i32_0 = arith.constant 0 : i32
    %c0_i32_1 = arith.constant 0 : i32
    %c0_i32_2 = arith.constant 0 : i32
    return %arg0, %c0_i32, %c0_i32_0, %c0_i32_1 : i32, i32, i32, i32
  }
  func.func @transform_1(%arg0: i32, %arg1: i32) -> (i32, i32) {
    %c0_i32 = arith.constant 0 : i32
    %c0_i32_0 = arith.constant 0 : i32
    %c0_i32_1 = arith.constant 0 : i32
    return %c0_i32, %c0_i32_0 : i32, i32
  }
  func.func @transform_2(%arg0: i32, %arg1: i32) -> (i32, i32) {
    %c0_i32 = arith.constant 0 : i32
    %c0_i32_0 = arith.constant 0 : i32
    %c0_i32_1 = arith.constant 0 : i32
    return %c0_i32, %c0_i32_0 : i32, i32
  }
  func.func @transform_3(%arg0: i32, %arg1: i32) -> (i32, i32, i32, i32) {
    %c0_i32 = arith.constant 0 : i32
    %c0_i32_0 = arith.constant 0 : i32
    %c0_i32_1 = arith.constant 0 : i32
    return %arg0, %arg1, %c0_i32, %c0_i32_0 : i32, i32, i32, i32
  }
  func.func @transform_4(%arg0: i32, %arg1: i32) -> (i32, i32, i32) {
    %c0_i32 = arith.constant 0 : i32
    %c0_i32_0 = arith.constant 0 : i32
    %c0_i32_1 = arith.constant 0 : i32
    return %arg0, %c0_i32, %c0_i32_0 : i32, i32, i32
  }
}

</mosaic_0001>

<bundles_post_ra>
// kernel: tpu_custom_call.1
= control target key start
LH: loop header
LB: loop body
LE: loop exit
PB: predicated region body
PF: predicated region fallthrough
CT: control target
= control target key end

     0   :  { %10 = vsyncpa [#allocation3], 0  ;;  %s3994_s0 = inlined_call_operand.hbm [shape: bf16[2,10,18,72], index: 0, kind: input, shape index: {}]   ;;  %s3995_s1 = inlined_call_operand.hbm [shape: bf16[648,128], index: 1, kind: input, shape index: {}]   ;;  %s3996_s2 = inlined_call_operand.hbm [shape: f32[1,128], index: 2, kind: input, shape index: {}]   ;;  %s3997_s3 = inlined_call_operand.hbm [shape: f32[2,8,16,128], index: 3, kind: output, shape index: {0}]   ;;  %s3998_s4 = inlined_call_operand.hbm [shape: f32[2,2,128], index: 4, kind: output, shape index: {1}]  }
   0x1   :  { %12 = vsyncpa [#allocation3 + $0x1], 0 }
   0x2   :  { %13 = vsyncpa [#allocation6], 0 }
   0x3   :  { %14 = vsyncpa [#allocation4], 0 }
   0x4   :  { %16 = vsyncpa [#allocation4 + $0x1], 0 }
   0x5   :  { %17 = vsyncpa [#allocation10], 0 }
   0x6   :  { %19 = vsyncpa [#allocation10 + $0x1], 0  ;;  %s3036_s15 = smov 0   ;;  %s3038_s16 = smov 0  }
   0x7   :  { %s3040_s17 = smov 0   ;;  %s3042_s18 = smov 0  }
   0x8   :  { %s3044_s19 = smov 0   ;;  %s3046_s20 = smov 0  }
   0x9 LB: > { %s2216_s21 = sadd.s32 4294967295, %s2990_s20   ;;  %s2217_s22 = sadd.s32 4294967294, %s2990_s20   ;;  %s2990_s20 = sphi %s3046_s20, %s25_s20   ;;  %s2986_s19 = sphi %s3044_s19, %s4022_s19   ;;  %s2982_s18 = sphi %s3042_s18, %s4021_s18   ;;  %s2978_s17 = sphi %s3040_s17, %s4020_s17   ;;  %s2974_s16 = sphi %s3038_s16, %s4019_s16   ;;  %s2970_s15 = sphi %s3036_s15, %s4018_s15  }
   0xa   : > { %p57_p0 = scmp.ne.s32.totalorder %s2974_s16, %s2970_s15  ;;  %p3070_p1 = scmp.eq.s32.totalorder %s2216_s21, 0 }
   0xb   : > { %p3074_p2 = scmp.eq.s32.totalorder %s2216_s21, 1  ;;  %p131_p3 = scmp.eq.s32.totalorder %s2217_s22, 1 }
   0xc   : > { %s4004_s23 = scalar_select %p3070_p1, 1, 0 }
   0xd   : > { %p3080_p4 = por %p3070_p1, %p57_p0  ;;  %p2218_p5 = scmp.ge.s32.totalorder %s2990_s20, 1 }
   0xe   : > { %p3085_p6 = por %p131_p3, %p57_p0  ;;  %p164_p7 = scmp.lt.s32.totalorder %s2990_s20, 3 }
   0xf   : > { %s4006_s25 = scalar_select %p3080_p4, 1, 0 }
  0x10   : > { %s4007_s26 = scalar_select %p3085_p6, 1, 0 }
  0x11   : > { %p3090_p8 = pnand %p2218_p5, %p164_p7  ;;  %s2992_s28 = smov [#allocation5]  }
  0x12   : > { %s176_s29 = sshll.u32 %s2992_s28, 4  ;;  %s2993_s5 = smov [#allocation7]   ;;  %s3094_s29 = int_to_ptr.vmem [resolvable:$true] %s176_s29 }
  0x13   : > { %p2585_p9 = pneg %p3090_p8  ;;  %s190_s6 = sshll.u32 %s2993_s5, 4  ;;  %s3105_s6 = int_to_ptr.vmem [resolvable:$true] %s190_s6 }
  0x14   : > { %s2786_s9 = scalar_lea.hbm %s3995_s1, 5184 }
  0x15   : > { %p3101_p11 = pnand %p2585_p9, %p3070_p1  ;;  %p2787_p12 = scmp.ne.s32.totalorder %s3995_s1, %s2786_s9 }
  0x16   : > { %p2793_p5 = scmp.lt.u32.totalorder %s2786_s9, %s3995_s1 }
  0x17   : > { %p2788_p13 = pneg %p3101_p11 }
  0x19   : > { %p2789_p0 = pnand %p2788_p13, %p2787_p12 }
  0x1b   : > { %p2790_p3 = pneg %p2789_p0 }
  0x1d   : > { %p2795_p7 = pnand %p2793_p5, %p2790_p3 }
  0x1f   : > { %2798 = shalt.err (!%p2795_p7)
}
  0x20   : > { %s2799_s14 = scalar_lea.vmem %s3094_s29, 5184  ;;  %p2807_p1 = scmp.lt.s32.totalorder %s3094_s29, %s3094_s29 }
  0x21   : > { %p2800_p9 = scmp.ne.s32.totalorder %s3094_s29, %s2799_s14  ;;  %p2808_p12 = scmp.lt.s32.totalorder %s2799_s14, %s2799_s14 }
  0x23   : > { %p2802_p10 = pnand %p2800_p9, %p2788_p13  ;;  %p2809_p0 = por %p2808_p12, %p2807_p1 }
  0x25   : > { %p2803_p6 = pneg %p2802_p10 }
  0x27   : > { %p2810_p4 = pnand %p2809_p0, %p2803_p6 }
  0x29   : > { %2813 = shalt.err (!%p2810_p4)
}
  0x2a   : > { %s4002_s21 = smov 64   ;;  %s2995_s22 = smov 4  }
  0x2b   : > { %2588 = dma.hbm_to_vmem [thread:$0]  (!%p3101_p11), %s3995_s1, 5184, %s3094_s29, [#allocation6], %s4002_s21, %s4002_s21, %s2995_s22  }
  0x2c   : > { %s2814_s9 = scalar_lea.hbm %s3996_s2, 16 }
  0x2d   : > { %p2815_p1 = scmp.ne.s32.totalorder %s3996_s2, %s2814_s9  ;;  %p2821_p10 = scmp.lt.u32.totalorder %s2814_s9, %s3996_s2 }
  0x2f   : > { %p2817_p4 = pnand %p2815_p1, %p2788_p13 }
  0x31   : > { %p2818_p6 = pneg %p2817_p4 }
  0x33   : > { %p2823_p3 = pnand %p2821_p10, %p2818_p6 }
  0x35   : > { %2826 = shalt.err (!%p2823_p3)
}
  0x36   : > { %s2827_s29 = scalar_lea.vmem %s3105_s6, 16  ;;  %s2834_s14 = scalar_lea.vmem %s3105_s6, 32 }
  0x37   : > { %p2828_p5 = scmp.ne.s32.totalorder %s3105_s6, %s2827_s29  ;;  %p2835_p12 = scmp.lt.s32.totalorder %s3105_s6, %s3105_s6 }
  0x38   : > { %p2836_p0 = scmp.lt.s32.totalorder %s2834_s14, %s2827_s29 }
  0x39   : > { %p2830_p7 = pnand %p2828_p5, %p2788_p13 }
  0x3a   : > { %p2837_p1 = por %p2836_p0, %p2835_p12 }
  0x3b   : > { %p2831_p9 = pneg %p2830_p7 }
  0x3d   : > { %p2838_p4 = pnand %p2837_p1, %p2831_p9 }
  0x3f   : > { %2841 = shalt.err (!%p2838_p4)
}
  0x40   : > { %2591 = dma.hbm_to_vmem [thread:$0]  (!%p3101_p11), %s3996_s2, 16, %s3105_s6, [#allocation6]  }
  0x41   : > { %s37_s7 = sadd.s32 1, %s2986_s19  ;;  %s44_s8 = sadd.s32 1, %s2978_s17 }
  0x42   : > { %p39_p13 = scmp.ge.s32.totalorder %s37_s7, 2  ;;  %p51_p6 = scmp.ne.s32.totalorder %s2978_s17, %s2974_s16 }
  0x43   : > { %p52_p10 = scmp.eq.s32.totalorder %s2990_s20, 0  ;;  %p2605_p3 = scmp.lt.s32.totalorder %s2990_s20, 2 }
  0x44   : > { %s4024_s7 = smov (%p39_p13, %s37_s7), 0  ;;  %p3173_p7 = por %p3074_p2, %p51_p6 }
  0x45   : > { %p53_p5 = por %p52_p10, %p51_p6  ;;  %s41_s9 = ssub.s32 %s2986_s19, %s4024_s7 }
  0x46   : > { %s4010_s30 = scalar_select %p3173_p7, 1, 0 }
  0x47   : > { %s201_s10 = sand.u32 1, %s2978_s17   ;;  %p42_p9 = scmp.eq.s32.totalorder %s41_s9, 0 }
  0x48   : > { %s2568_s6 = smul.u32 120, %s201_s10  ;;  %p3180_p11 = pnand %p2605_p3, %p53_p5 }
  0x49   : > { %s3185_s12 = scalar_select %p42_p9, %s2978_s17, %s44_s8  }
  0x4a   : > { %s2569_s13 = smul.u32 1920, %s2986_s19  ;;  %s205_s29 = scalar_lea.vmem [#allocation2], %s2568_s6 }
  0x4b   : > { %s212_s14 = sshll.u32 %s205_s29, 4  ;;  %s3195_s9 = scalar_lea.sflag [#allocation3], %s201_s10  ;;  %s3193_s14 = int_to_ptr.vmem [resolvable:$true] %s212_s14 }
  0x4c   : > { %s3191_s5 = scalar_lea.hbm %s3994_s0, %s2569_s13  ;;  %p2844_p12 = pneg %p3180_p11 }
  0x4d   : > { %s2842_s21 = scalar_lea.hbm %s3191_s5, 1920  ;;  %s2847_s13 = scalar_lea.hbm %s3994_s0, 3840 }
  0x4e   : > { %p2843_p2 = scmp.ne.s32.totalorder %s3191_s5, %s2842_s21  ;;  %p2848_p4 = scmp.lt.u32.totalorder %s3191_s5, %s3994_s0 }
  0x4f   : > { %p2849_p13 = scmp.lt.u32.totalorder %s2847_s13, %s2842_s21  ;;  %p2851_p10 = scmp.lt.u32.totalorder %s2842_s21, %s3191_s5 }
  0x50   : > { %p2845_p0 = pnand %p2844_p12, %p2843_p2 }
  0x51   : > { %p2850_p6 = por %p2849_p13, %p2848_p4 }
  0x52   : > { %p2846_p1 = pneg %p2845_p0 }
  0x53   : > { %p2852_p3 = por %p2851_p10, %p2850_p6 }
  0x55   : > { %p2853_p5 = pnand %p2852_p3, %p2846_p1 }
  0x57   : > { %2856 = shalt.err (!%p2853_p5)
}
  0x58   : > { %s2857_s10 = scalar_lea.vmem %s3193_s14, 1920  ;;  %s2996_s28 = smov [#allocation2]  }
  0x59   : > { %p2858_p9 = scmp.ne.s32.totalorder %s3193_s14, %s2857_s10  ;;  %s2862_s8 = sshll.u32 %s2996_s28, 4  ;;  %s2863_s8 = int_to_ptr.vmem [resolvable:$false] %s2862_s8 }
  0x5a   : > { %s2864_s6 = scalar_lea.vmem %s2863_s8, 3840  ;;  %p2865_p7 = scmp.lt.s32.totalorder %s3193_s14, %s2863_s8 }
  0x5b   : > { %p2860_p2 = pnand %p2858_p9, %p2844_p12  ;;  %p2866_p4 = scmp.lt.s32.totalorder %s2864_s6, %s2857_s10 }
  0x5d   : > { %p2861_p0 = pneg %p2860_p2  ;;  %p2867_p13 = por %p2866_p4, %p2865_p7 }
  0x5f   : > { %p2868_p6 = pnand %p2867_p13, %p2861_p0 }
  0x61   : > { %2871 = shalt.err (!%p2868_p6)
}
  0x62   : > { %s4012_s21 = smov 64   ;;  %224 = sbr.rel (%p3090_p8) target bundleno = 636 (0x27c), region = 32 }
  0x63   : > { %2595 = dma.hbm_to_vmem [thread:$0]  (!%p3180_p11), %s3191_s5, 1920, %s3193_s14, %s3195_s9, %s4012_s21, %s4012_s21, %s2995_s22  }
  0x64   : > { %s3229_s13 = sand.u32 (!%p3090_p8), 1, %s2974_s16   ;;  %p4013_p7 = scmp.ne.s32.totalorder (!%p3090_p8), %s4006_s25, 0 }
  0x65   : > { %s2570_s29 = smul.u32 (!%p3090_p8), 120, %s3229_s13  ;;  %s227_s24 = scalar_lea.sflag (!%p3090_p8), [#allocation3], %s3229_s13 }
  0x67   : > { %s3233_s10 = scalar_lea.vmem (!%p3090_p8), [#allocation2], %s2570_s29 }
  0x69   : > { %2953 = dma.done.wait (%p4013_p7), %s227_s24, 1920  }
  0x6a   : > { %2955 = vsyncadd (%p4013_p7), %s227_s24, 4294965376  ;;  %p4014_p11 = scmp.ne.s32.totalorder %s4004_s23, 0 }
  0x6c   : > { %2957 = dma.done.wait (%p4014_p11), [#allocation6], 5200  }
  0x6d   : > { %2959 = vsyncadd (%p4014_p11), [#allocation6], 4294962096  ;;  %v2228_v0 = vld [vmem:[%s3233_s10 + $0xc] sm:$0xf]  ;;  %v2229_v1 = vld [vmem:[%s3233_s10 + $0x10] sm:$0xf] }
  0x6e   : > { %v2252_v2 = vld [vmem:[%s3233_s10 + $0xc] sm:$0xe]  ;;  %v3246_v3 = vcombine.low %v2228_v0, %v2229_v1  ;;  %v275_v4 = vld [vmem:[%s3233_s10 + $0x4] sm:$0xf]  ;;  %v298_v5 = vld [vmem:[%s3233_s10] sm:$0xe] }
  0x6f   : > { %v2675_v6 = vld [vmem:[%s3233_s10 + $0x8] ss:$0 sps:$4 sm:$0x11]   ;;  %v2308_v7 = vcombine.low %v298_v5, %v275_v4  ;;  %v274_v8 = vld [vmem:[%s3233_s10] sm:$0xf]  ;;  %v2741_v9 = vld [vmem:[#allocation5 + $0x40] sm:$0xff]   ;;  %v2332_v10 = vcombine.low %v2252_v2, %v2229_v1 }
  0x70   : > { %s2997_s23 = smov 88   ;;  %vm579_vm0 = vcmask 1046528   ;;  %v3254_v11 = vcombine.low %v274_v8, %v275_v4  ;;  %v2230_v12 = vld [vmem:[%s3233_s10 + $0x18] sm:$0xf]  ;;  %v3258_v13 = vld [vmem:[%s3233_s10 + $0x1c] sm:$0xf]  ;;  %2422 = vmatprep.subr.bf16.mxu0 %v2741_v9 }
  0x71   : > { %660 = vrot.lane.b32.xlu1 %v3246_v3, %s2997_s23  ;;  %v580_v14 = vrot.slane %v2308_v7, 1  ;;  %v581_v15 = vrot.slane %v2675_v6, 1  ;;  %v3261_v16 = vcombine.low %v2230_v12, %v3258_v13  ;;  %v276_v17 = vld [vmem:[%s3233_s10 + $0xc] sm:$0xf]  ;;  %vm442_vm1 = vsmask.f32 7424 }
  0x72   : > { %v277_v18 = vld [vmem:[%s3233_s10 + $0x10] sm:$0xf]  ;;  %v299_v19 = vld [vmem:[%s3233_s10 + $0xc] sm:$0xe]  ;;  %v2260_v23 = vld [vmem:[%s3233_s10 + $0x18] sm:$0xf] }
  0x73   : > { %v582_v20 = vsel %vm579_vm0, %v580_v14, %v581_v15  ;;  %v2681_v21 = vld [vmem:[%s3233_s10 + $0x14] ss:$0 sps:$4 sm:$0x11]   ;;  %v2309_v22 = vcombine.low %v299_v19, %v277_v18  ;;  %v703_v24 = vshll.u32 %v3246_v3, 16  ;;  %s2998_s25 = smov 16   ;;  %v836_v26 = vrot.slane %v2332_v10, 1 }
  0x74   : > { %604 = vrot.lane.b32.xlu0 %v582_v20, %s2998_s25  ;;  %v3274_v25 = vld [vmem:[%s3233_s10 + $0x1c] sm:$0xf]  ;;  %v444_v27 = vshrl.u32 %v3254_v11, 16  ;;  %v446_v28 = vshll.u32 %v3254_v11, 16  ;;  %v3278_v29 = vcombine.low %v276_v17, %v277_v18  ;;  %v584_v31 = vrot.slane %v2681_v21, 1  ;;  %s2999_s27 = smov 48  }
  0x75   : > { %662 = vrot.lane.b32.xlu1 %v3261_v16, %s2997_s23  ;;  %v583_v30 = vrot.slane %v2309_v22, 1  ;;  %v3281_v32 = vcombine.low %v2260_v23, %v3274_v25  ;;  %v279_v33 = vld [vmem:[%s3233_s10 + $0x1c] sm:$0xf]  ;;  %v2685_v34 = vld [vmem:[%s3233_s10 + $0x14] ss:$0 sps:$4 sm:$0x11]  }
  0x76   : > { %v448_v35 = vrot.slane %v446_v28, 1  ;;  %v300_v38 = vld [vmem:[%s3233_s10 + $0x18] sm:$0xe]  ;;  %v2686_v39 = vld [vmem:[%s3233_s10 + $0x20] ss:$0 sps:$4 sm:$0x11]  }
  0x77   : > { %v585_v36 = vsel %vm579_vm0, %v583_v30, %v584_v31  ;;  %v959_v37 = vshll.u32 %v3281_v32, 16  ;;  %v837_v40 = vrot.slane %v2685_v34, 1  ;;  %v2310_v41 = vcombine.low %v300_v38, %v279_v33  ;;  %v278_v42 = vld [vmem:[%s3233_s10 + $0x18] sm:$0xf]  ;;  %v280_v59 = vld [vmem:[%s3233_s10 + $0x24] sm:$0xf] }
  0x78   : > { %606 = vrot.lane.b32.xlu0 %v585_v36, %s2998_s25  ;;  %v449_v43 = vor.u32 %v448_v35, %v444_v27  ;;  %v451_v44 = vshll.u32 %v2675_v6, 16  ;;  %v587_v45 = vrot.slane %v2686_v39, 1  ;;  %v3293_v46 = vcombine.low %v278_v42, %v279_v33  ;;  %v2742_v49 = vld [vmem:[#allocation5] sm:$0xff]   ;;  %v2744_v54 = vld [vmem:[#allocation5 + $0x48] sm:$0xff]   ;;  %s3000_s22 = smov 104   ;;  %s3001_s11 = smov 72  }
  0x79   : > { %916 = vrot.lane.b32.xlu1 %v3281_v32, %s2999_s27  ;;  %v456_v47 = vshrl.u32 %v3278_v29, 16  ;;  %v458_v48 = vshll.u32 %v3278_v29, 16  ;;  %v838_v50 = vsel %vm579_vm0, %v836_v26, %v837_v40  ;;  %v586_v51 = vrot.slane %v2310_v41, 1  ;;  %2423 = vmatpush3.bf16.msra.mxu0 %v2742_v49  ;;  %v2253_v60 = vld [vmem:[%s3233_s10 + $0x18] sm:$0xe]  ;;  %s3002_s14 = smov 32  }
  0x7a   : > { %v453_v52 = vrot.slane %v451_v44, 1  ;;  %v463_v53 = vshll.u32 %v2681_v21, 16  ;;  %v468_v56 = vshrl.u32 %v3293_v46, 16  ;;  %v470_v57 = vshll.u32 %v3293_v46, 16  ;;  %v3307_v1 = vld [vmem:[%s3233_s10 + $0x28] sm:$0xf]  ;;  %2424 = vmatprep.subr.bf16.mxu0 %v2744_v54 }
  0x7b   : > { %v460_v55 = vrot.slane %v458_v48, 1  ;;  %v475_v58 = vshll.u32 %v2686_v39, 16  ;;  %v588_v61 = vsel %vm579_vm0, %v586_v51, %v587_v45  ;;  %v701_v0 = vshrl.u32 %v3246_v3, 16  ;;  %v3311_v7 = vld [vmem:[%s3233_s10 + $0x2c] ss:$0 sps:$4 sm:$0x11]  }
  0x7c   : > { %860 = vrot.lane.b32.xlu0 %v838_v50, %s3000_s22  ;;  %v454_v62 = vsel %vm442_vm1, %v449_v43, %v453_v52  ;;  %v465_v63 = vrot.slane %v463_v53, 1  ;;  %v472_v4 = vrot.slane %v470_v57, 1  ;;  %v705_v6 = vrot.slane %v703_v24, 1  ;;  %v3317_v10 = vld [vmem:[%s3233_s10 + $0x20] ss:$0 sps:$4 sm:$0x11]  }
  0x7d   : > { %608 = vrot.lane.b32.xlu1 %v588_v61, %s2998_s25  ;;  %v461_v2 = vor.u32 %v460_v55, %v456_v47  ;;  %v477_v5 = vrot.slane %v475_v58, 1  ;;  %v708_v8 = vshll.u32 %v2685_v34, 16  ;;  %v3314_v9 = vcombine.low %v280_v59, %v3307_v1  ;;  %v2232_v15 = vld [vmem:[%s3233_s10 + $0x24] sm:$0xf]  ;;  %v3324_v19 = vld [vmem:[%s3233_s10 + $0x28] sm:$0xf] }
  0x7e   : > { %v473_v12 = vor.u32 %v472_v4, %v468_v56  ;;  %v706_v14 = vor.u32 %v705_v6, %v701_v0  ;;  %v487_v17 = vshll.u32 %v3311_v7, 16  ;;  %v2333_v22 = vcombine.low %v2253_v60, %v3258_v13  ;;  %v3333_v27 = vld [vmem:[%s3233_s10 + $0x20] ss:$0 sps:$4 sm:$0x11]   ;;  %v301_v35 = vld [vmem:[%s3233_s10 + $0x24] sm:$0xe] }
  0x7f   : > { %v466_v3 = vsel %vm442_vm1, %v461_v2, %v465_v63  ;;  %v710_v18 = vrot.slane %v708_v8, 1  ;;  %v480_v20 = vshrl.u32 %v3314_v9, 16  ;;  %v482_v21 = vshll.u32 %v3314_v9, 16  ;;  %v2745_v28 = vld [vmem:[#allocation5 + $0x8] sm:$0xff]   ;;  %v2746_v13 = vld [vmem:[#allocation5 + $0x50] sm:$0xff]   ;;  %v2750_v52 = vld [vmem:[#allocation5 + $0xc0] sm:$0xff]  }
  0x80   : > { %539 = vrot.lane.b32.xlu0 %v454_v62, %s3001_s11  ;;  %v478_v23 = vsel %vm442_vm1, %v473_v12, %v477_v5  ;;  %v957_v24 = vshrl.u32 %v3281_v32, 16  ;;  %v961_v26 = vrot.slane %v959_v37, 1  ;;  %v489_v33 = vrot.slane %v487_v17, 1  ;;  %v2262_v36 = vld [vmem:[%s3233_s10 + $0x24] sm:$0xf]  ;;  %2425 = vmatpush3.bf16.msra.mxu0 %v2745_v28  ;;  %v2751_v0 = vld [vmem:[#allocation5 + $0x58] sm:$0xff]  }
  0x81   : > { %541 = vrot.lane.b32.xlu1 %v466_v3, %s3001_s11  ;;  %v711_v30 = vsel %vm442_vm1, %v706_v14, %v710_v18  ;;  %v484_v31 = vrot.slane %v482_v21, 1  ;;  %v964_v34 = vshll.u32 %v3317_v10, 16  ;;  %v3341_v32 = vcombine.low %v2232_v15, %v3324_v19  ;;  %v3344_v38 = vld [vmem:[%s3233_s10 + $0x28] sm:$0xf]  ;;  %2426 = vmatprep.subr.bf16.mxu0 %v2746_v13  ;;  %v282_v49 = vld [vmem:[%s3233_s10 + $0x30] sm:$0xf] }
  0x82   : > { %v2747_v39 = vld [vmem:[#allocation5 + $0x10] sm:$0xff]   ;;  %v962_v40 = vor.u32 %v961_v26, %v957_v24  ;;  %v2311_v42 = vcombine.low %v301_v35, %v3307_v1  ;;  %v3349_v43 = vcombine.low %v2262_v36, %v3344_v38  ;;  %v839_v47 = vrot.slane %v2333_v22, 1  ;;  %v283_v50 = vld [vmem:[%s3233_s10 + $0x34] sm:$0xf]  ;;  %v2234_v57 = vld [vmem:[%s3233_s10 + $0x30] sm:$0xf]  ;;  %2486 = vmatprep.subr.bf16.mxu1 %v2750_v52 }
  0x83   : > { %v485_v37 = vor.u32 %v484_v31, %v480_v20  ;;  %v966_v41 = vrot.slane %v964_v34, 1  ;;  %v3352_v44 = vld [vmem:[%s3233_s10 + $0x2c] ss:$0 sps:$4 sm:$0x11]   ;;  %v840_v48 = vrot.slane %v3333_v27, 1  ;;  %v715_v53 = vshll.u32 %v3261_v16, 16 }
  0x84   : > { %543 = vrot.lane.b32.xlu0 %v478_v23, %s3001_s11  ;;  %v971_v51 = vshll.u32 %v3349_v43, 16  ;;  %2427 = vmatpush3.bf16.msra.mxu0 %v2747_v39  ;;  %v589_v55 = vrot.slane %v2311_v42, 1  ;;  %v590_v56 = vrot.slane %v3311_v7, 1  ;;  %v3366_v58 = vcombine.low %v282_v49, %v283_v50  ;;  %v3370_v60 = vld [vmem:[%s3233_s10 + $0x34] sm:$0xf]  ;;  %s3003_s5 = smov 120  }
  0x85   : > { %796 = vrot.lane.b32.xlu1 %v711_v30, %s3002_s14  ;;  %v490_v45 = vsel %vm442_vm1, %v485_v37, %v489_v33  ;;  %v967_v54 = vsel %vm442_vm1, %v962_v40, %v966_v41  ;;  %v841_v59 = vsel %vm579_vm0, %v839_v47, %v840_v48  ;;  %v969_v61 = vshrl.u32 %v3349_v43, 16  ;;  %v302_v2 = vld [vmem:[%s3233_s10 + $0x30] sm:$0xe]  ;;  %2428 = vmatprep.subr.bf16.mxu0 %v2751_v0  ;;  %v2702_v3 = vld [vmem:[%s3233_s10 + $0x38] ss:$0 sps:$4 sm:$0x11]  }
  0x86   : > { %v973_v62 = vrot.slane %v971_v51, 1  ;;  %v976_v63 = vshll.u32 %v3352_v44, 16  ;;  %v720_v1 = vshll.u32 %v3333_v27, 16  ;;  %v2752_v4 = vld [vmem:[#allocation5 + $0x80] sm:$0xff]   ;;  %v713_v5 = vshrl.u32 %v3261_v16, 16  ;;  %v2753_v18 = vld [vmem:[#allocation5 + $0x18] sm:$0xff]  }
  0x87   : > { %v717_v6 = vrot.slane %v715_v53, 1  ;;  %v591_v7 = vsel %vm579_vm0, %v589_v55, %v590_v56  ;;  %v3381_v8 = vcombine.low %v2234_v57, %v3370_v60  ;;  %v494_v12 = vshll.u32 %v3366_v58, 16  ;;  %2487 = vmatpush3.bf16.msra.mxu1 %v2752_v4  ;;  %v2254_v16 = vld [vmem:[%s3233_s10 + $0x24] sm:$0xe]  ;;  %v284_v21 = vld [vmem:[%s3233_s10 + $0x3c] sm:$0xf] }
  0x88   : > { %664 = vrot.lane.b32.xlu0 %v3341_v32, %s2997_s23  ;;  %v974_v14 = vor.u32 %v973_v62, %v969_v61  ;;  %v978_v15 = vrot.slane %v976_v63, 1  ;;  %v2312_v17 = vcombine.low %v302_v2, %v283_v50  ;;  %v722_v20 = vrot.slane %v720_v1, 1  ;;  %v3388_v22 = vld [vmem:[%s3233_s10 + $0x40] sm:$0xf]  ;;  %2429 = vmatpush3.bf16.msra.mxu0 %v2753_v18  ;;  %v2264_v36 = vld [vmem:[%s3233_s10 + $0x30] sm:$0xf] }
  0x89   : > { %545 = vrot.lane.b32.xlu1 %v490_v45, %s3001_s11  ;;  %v718_v23 = vor.u32 %v717_v6, %v713_v5  ;;  %v2706_v24 = vld [vmem:[%s3233_s10 + $0x2c] ss:$0 sps:$4 sm:$0x11]   ;;  %v2755_v26 = vld [vmem:[#allocation5 + $0xc8] sm:$0xff]   ;;  %v727_v27 = vshll.u32 %v3341_v32, 16  ;;  %v492_v28 = vshrl.u32 %v3366_v58, 16  ;;  %v3398_v13 = vcombine.low %v284_v21, %v3388_v22 }
  0x8a   : > { %v496_v30 = vrot.slane %v494_v12, 1  ;;  %v499_v31 = vshll.u32 %v2702_v3, 16  ;;  %v979_v33 = vsel %vm442_vm1, %v974_v14, %v978_v15  ;;  %v592_v34 = vrot.slane %v2312_v17, 1  ;;  %2488 = vmatprep.subr.bf16.mxu1 %v2755_v26  ;;  %v3402_v37 = vld [vmem:[%s3233_s10 + $0x34] sm:$0xf]  ;;  %v2757_v5 = vld [vmem:[#allocation5 + $0x88] sm:$0xff]  }
  0x8b   : > { %v593_v35 = vrot.slane %v2702_v3, 1  ;;  %v2334_v39 = vcombine.low %v2254_v16, %v3324_v19  ;;  %v723_v40 = vsel %vm442_vm1, %v718_v23, %v722_v20  ;;  %v732_v41 = vshll.u32 %v2706_v24, 16  ;;  %v2255_v49 = vld [vmem:[%s3233_s10 + $0x30] sm:$0xe]  ;;  %v2236_v52 = vld [vmem:[%s3233_s10 + $0x3c] sm:$0xf]  ;;  %2489 = vmatpush3.bf16.msra.mxu1 %v2757_v5 }
  0x8c   : > { %1052 = vrot.lane.b32.xlu0 %v967_v54, %s3003_s5  ;;  %v497_v42 = vor.u32 %v496_v30, %v492_v28  ;;  %v501_v45 = vrot.slane %v499_v31, 1  ;;  %v725_v47 = vshrl.u32 %v3341_v32, 16  ;;  %v729_v48 = vrot.slane %v727_v27, 1  ;;  %v3414_v19 = vld [vmem:[%s3233_s10 + $0x44] ss:$0 sps:$4 sm:$0x11]  }
  0x8d   : > { %862 = vrot.lane.b32.xlu1 %v841_v59, %s3000_s22  ;;  %v594_v50 = vsel %vm579_vm0, %v592_v34, %v593_v35  ;;  %v2342_v51 = vcombine.low %v2264_v36, %v3402_v37  ;;  %v3419_v53 = vld [vmem:[%s3233_s10 + $0x40] sm:$0xf]  ;;  %v2756_v54 = vld [vmem:[#allocation5 + $0x60] sm:$0xff]   ;;  %v842_v32 = vrot.slane %v2334_v39, 1  ;;  %v843_v56 = vrot.slane %v2706_v24, 1  ;;  %s3005_s9 = smov 64  }
  0x8e   : > { %v734_v57 = vrot.slane %v732_v41, 1  ;;  %v2335_v59 = vcombine.low %v2255_v49, %v3370_v60  ;;  %v502_v61 = vsel %vm442_vm1, %v497_v42, %v501_v45  ;;  %v730_v62 = vor.u32 %v729_v48, %v725_v47  ;;  %v3426_v63 = vld [vmem:[%s3233_s10 + $0x38] ss:$0 sps:$4 sm:$0x11]   ;;  %2430 = vmatprep.subr.bf16.mxu0 %v2756_v54  ;;  %v2266_v60 = vld [vmem:[%s3233_s10 + $0x3c] sm:$0xf] }
  0x8f   : > { %v983_v55 = vshll.u32 %v2342_v51, 16  ;;  %v2712_v0 = vld [vmem:[%s3233_s10 + $0x38] ss:$0 sps:$4 sm:$0x11]   ;;  %v504_v1 = vshrl.u32 %v3398_v13, 16  ;;  %v511_v4 = vshll.u32 %v3414_v19, 16  ;;  %v3432_v6 = vcombine.low %v2236_v52, %v3419_v53 }
  0x90   : > { %610 = vrot.lane.b32.xlu0 %v591_v7, %s2998_s25  ;;  %v3436_v7 = vld [vmem:[%s3233_s10 + $0x40] sm:$0xf]  ;;  %v739_v3 = vshll.u32 %v3381_v8, 16  ;;  %v844_v12 = vsel %vm579_vm0, %v842_v32, %v843_v56  ;;  %v2256_v14 = vld [vmem:[%s3233_s10 + $0x3c] sm:$0xe]  ;;  %v981_v15 = vshrl.u32 %v2342_v51, 16  ;;  %v735_v16 = vsel %vm442_vm1, %v730_v62, %v734_v57 }
  0x91   : > { %666 = vrot.lane.b32.xlu1 %v3381_v8, %s2997_s23  ;;  %v985_v17 = vrot.slane %v983_v55, 1  ;;  %v2758_v18 = vld [vmem:[#allocation5 + $0x20] sm:$0xff]   ;;  %v751_v20 = vshll.u32 %v3432_v6, 16  ;;  %v988_v21 = vshll.u32 %v3426_v63, 16  ;;  %v845_v23 = vrot.slane %v2335_v59, 1  ;;  %v2759_v34 = vld [vmem:[#allocation5 + $0xd0] sm:$0xff]  }
  0x92   : > { %v303_v24 = vld [vmem:[%s3233_s10 + $0x3c] sm:$0xe]  ;;  %v513_v27 = vrot.slane %v511_v4, 1  ;;  %v846_v28 = vrot.slane %v2712_v0, 1  ;;  %v3448_v30 = vcombine.low %v2266_v60, %v3436_v7  ;;  %2431 = vmatpush3.bf16.msra.mxu0 %v2758_v18  ;;  %v2238_v31 = vld [vmem:[%s3233_s10 + $0x48] sm:$0xf]  ;;  %v2336_v35 = vcombine.low %v2256_v14, %v3419_v53  ;;  %2490 = vmatprep.subr.bf16.mxu1 %v2759_v34 }
  0x93   : > { %v986_v36 = vor.u32 %v985_v17, %v981_v15  ;;  %v2313_v39 = vcombine.low %v303_v24, %v3388_v22  ;;  %v286_v41 = vld [vmem:[%s3233_s10 + $0x48] sm:$0xf]  ;;  %v287_v42 = vld [vmem:[%s3233_s10 + $0x4c] sm:$0xf]  ;;  %v990_v45 = vrot.slane %v988_v21, 1  ;;  %v596_v47 = vrot.slane %v3414_v19, 1 }
  0x94   : > { %918 = vrot.lane.b32.xlu0 %v3349_v43, %s2999_s27  ;;  %v506_v43 = vshll.u32 %v3398_v13, 16  ;;  %v737_v48 = vshrl.u32 %v3381_v8, 16  ;;  %v744_v49 = vshll.u32 %v2712_v0, 16  ;;  %v2257_v22 = vld [vmem:[%s3233_s10 + $0x48] sm:$0xe]  ;;  %v3470_v55 = vcombine.low %v286_v41, %v287_v42  ;;  %v2760_v32 = vld [vmem:[#allocation5 + $0x68] sm:$0xff]  }
  0x95   : > { %1054 = vrot.lane.b32.xlu1 %v979_v33, %s3003_s5  ;;  %v3452_v33 = vld [vmem:[%s3233_s10 + $0x44] ss:$0 sps:$4 sm:$0x11]   ;;  %v304_v54 = vld [vmem:[%s3233_s10 + $0x48] sm:$0xe]  ;;  %v847_v8 = vsel %vm579_vm0, %v845_v23, %v846_v28  ;;  %v595_v19 = vrot.slane %v2313_v39, 1  ;;  %v991_v57 = vsel %vm442_vm1, %v986_v36, %v990_v45  ;;  %2432 = vmatprep.subr.bf16.mxu0 %v2760_v32 }
  0x96   : > { %v508_v2 = vrot.slane %v506_v43, 1  ;;  %v741_v43 = vrot.slane %v739_v3, 1  ;;  %v1000_v53 = vshll.u32 %v3452_v33, 16  ;;  %v3476_v56 = vld [vmem:[%s3233_s10 + $0x50] ss:$0 sps:$4 sm:$0x11]  }
  0x97   : > { %v3481_v62 = vrot.slane %v2336_v35, 1  ;;  %v993_v0 = vshrl.u32 %v3448_v30, 16  ;;  %v749_v4 = vshrl.u32 %v3432_v6, 16  ;;  %v2761_v5 = vld [vmem:[#allocation5 + $0x90] sm:$0xff]   ;;  %v2762_v15 = vld [vmem:[#allocation5 + $0x28] sm:$0xff]   ;;  %v516_v17 = vshrl.u32 %v3470_v55, 16 }
  0x98   : > { %798 = vrot.lane.b32.xlu0 %v723_v40, %s3002_s14  ;;  %v509_v26 = vor.u32 %v508_v2, %v504_v1  ;;  %v2239_v40 = vld [vmem:[%s3233_s10 + $0x4c] sm:$0xf]  ;;  %v2314_v2 = vcombine.low %v304_v54, %v287_v42  ;;  %v1002_v3 = vrot.slane %v1000_v53, 1  ;;  %v3487_v14 = vld [vmem:[%s3233_s10 + $0x44] ss:$0 sps:$4 sm:$0x11]   ;;  %2491 = vmatpush3.bf16.msra.mxu1 %v2761_v5  ;;  %v597_v23 = vsel %vm579_vm0, %v595_v19, %v596_v47 }
  0x99   : > { %612 = vrot.lane.b32.xlu1 %v594_v50, %s2998_s25  ;;  %v3466_v52 = vcombine.low %v2238_v31, %v2239_v40  ;;  %v2337_v60 = vcombine.low %v2257_v22, %v2239_v40  ;;  %v523_v18 = vshll.u32 %v3476_v56, 16  ;;  %v3494_v21 = vld [vmem:[%s3233_s10 + $0x4c] sm:$0xf]  ;;  %v599_v24 = vrot.slane %v3476_v56, 1  ;;  %v289_v28 = vld [vmem:[%s3233_s10 + $0x58] sm:$0xf]  ;;  %2433 = vmatpush3.bf16.msra.mxu0 %v2762_v15 }
  0x9a   : > { %v514_v50 = vsel %vm442_vm1, %v509_v26, %v513_v27  ;;  %v753_v26 = vrot.slane %v751_v20, 1  ;;  %v288_v27 = vld [vmem:[%s3233_s10 + $0x54] sm:$0xf]  ;;  %v598_v34 = vrot.slane %v2314_v2, 1  ;;  %v2284_v36 = vld [vmem:[%s3233_s10 + $0x18] sm:$0xe]  ;;  %v742_v20 = vor.u32 %v741_v43, %v737_v48 }
  0x9b   : > { %v763_v59 = vshll.u32 %v3466_v52, 16  ;;  %v3504_v35 = vld [vmem:[%s3233_s10 + $0x5c] ss:$0 sps:$4 sm:$0x11]   ;;  %v756_v41 = vshll.u32 %v3487_v14, 16  ;;  %v3511_v42 = vrot.slane %v2337_v60, 1  ;;  %v3521_v22 = vcombine.low %v288_v27, %v289_v28 }
  0x9c   : > { %547 = vrot.lane.b32.xlu0 %v502_v61, %s3001_s11  ;;  %v746_v61 = vrot.slane %v744_v49, 1  ;;  %v525_v45 = vrot.slane %v523_v18, 1  ;;  %v2240_v47 = vld [vmem:[%s3233_s10 + $0x54] sm:$0xf]  ;;  %v3516_v49 = vld [vmem:[%s3233_s10 + $0x58] sm:$0xf]  ;;  %v600_v5 = vsel %vm579_vm0, %v598_v34, %v599_v24 }
  0x9d   : > { %920 = vrot.lane.b32.xlu1 %v2342_v51, %s2999_s27  ;;  %v995_v51 = vshll.u32 %v3448_v30, 16  ;;  %v3524_v53 = vld [vmem:[%s3233_s10 + $0x50] ss:$0 sps:$4 sm:$0x11]   ;;  %v535_v32 = vshll.u32 %v3504_v35, 16  ;;  %v758_v19 = vrot.slane %v756_v41, 1  ;;  %v3534_v56 = vcombine.low %v2240_v47, %v3516_v49 }
  0x9e   : > { %v3529_v48 = vld [vmem:[%s3233_s10 + $0x50] ss:$0 sps:$4 sm:$0x11]   ;;  %v2285_v43 = vld [vmem:[%s3233_s10 + $0x24] sm:$0xe]  ;;  %v747_v2 = vsel %vm442_vm1, %v742_v20, %v746_v61  ;;  %v1093_v41 = vrot.slane %v3317_v10, 1 }
  0x9f   : > { %v997_v1 = vrot.slane %v995_v51, 1  ;;  %v2764_v15 = vld [vmem:[#allocation5 + $0x70] sm:$0xff]   ;;  %v537_v18 = vrot.slane %v535_v32, 1  ;;  %v2286_v61 = vld [vmem:[%s3233_s10 + $0x30] sm:$0xe]  ;;  %v1096_v32 = vrot.slane %v3352_v44, 1 }
  0xa0   : > { %864 = vrot.lane.b32.xlu0 %v844_v12, %s3000_s22  ;;  %v518_v12 = vshll.u32 %v3470_v55, 16  ;;  %v2242_v24 = vld [vmem:[%s3233_s10 + $0x60] sm:$0xf]  ;;  %v3552_v27 = vld [vmem:[%s3233_s10 + $0x64] sm:$0xf]  ;;  %2434 = vmatprep.subr.bf16.mxu0 %v2764_v15  ;;  %v2765_v20 = vld [vmem:[#allocation5 + $0x98] sm:$0xff]  }
  0xa1   : > { %800 = vrot.lane.b32.xlu1 %v735_v16, %s3002_s14  ;;  %v2268_v16 = vld [vmem:[%s3233_s10 + $0x48] sm:$0xf]  ;;  %v998_v31 = vor.u32 %v997_v1, %v993_v0  ;;  %v305_v0 = vld [vmem:[%s3233_s10 + $0x54] sm:$0xe]  ;;  %v2356_v1 = vcombine.low %v2284_v36, %v3274_v25  ;;  %v528_v25 = vshrl.u32 %v3521_v22, 16  ;;  %v3572_v10 = vcombine.low %v2242_v24, %v3552_v27  ;;  %s2227_s28 = sshll.u32 %s3229_s13, 1 }
  0xa2   : > { %v520_v39 = vrot.slane %v518_v12, 1  ;;  %v3508_v40 = vcombine.low %v2268_v16, %v3494_v21  ;;  %v530_v12 = vshll.u32 %v3521_v22, 16  ;;  %v852_v16 = vrot.slane %v3529_v48, 1  ;;  %v3563_v47 = vld [vmem:[%s3233_s10 + $0x58] sm:$0xf]  ;;  %s3817_s8 = scalar_lea.vmem [#allocation9], %s2227_s28 }
  0xa3   : > { %v1003_v54 = vsel %vm442_vm1, %v998_v31, %v1002_v3  ;;  %v775_v3 = vshll.u32 %v3534_v56, 16  ;;  %v2270_v31 = vld [vmem:[%s3233_s10 + $0x54] sm:$0xf]  ;;  %vm1157_vm2 = vcmask 130048   ;;  %vm1174_vm3 = vcmask 719872   ;;  %s2226_s6 = sshll.u32 %s3229_s13, 7 }
  0xa4   : > { %668 = vrot.lane.b32.xlu0 %v3432_v6, %s2997_s23  ;;  %v1007_v51 = vshll.u32 %v3508_v40, 16  ;;  %v521_v60 = vor.u32 %v520_v39, %v516_v17  ;;  %v2357_v17 = vcombine.low %v2285_v43, %v3344_v38  ;;  %v532_v36 = vrot.slane %v530_v12, 1  ;;  %v3575_v6 = vld [vmem:[%s3233_s10 + $0x5c] ss:$0 sps:$4 sm:$0x11]   ;;  %s3862_s21 = scalar_lea.vmem [#allocation8], %s2226_s6 }
  0xa5   : > { %549 = vrot.lane.b32.xlu1 %v514_v50, %s3001_s11  ;;  %v2763_v50 = vld [vmem:[#allocation5 + $0xd8] sm:$0xff]   ;;  %v1092_v39 = vrot.slane %v2356_v1, 1  ;;  %v1024_v15 = vshll.u32 %v3575_v6, 16  ;;  %v853_v24 = vsel %vm579_vm0, %v3511_v42, %v852_v16  ;;  %v2767_v42 = vld [vmem:[#allocation5 + $0xe0] sm:$0xff]   ;;  %vm1132_vm4 = vcmask 588800   ;;  %s2421_s29 = sshll.u32 %s2982_s18, 11 }
  0xa6   : > { %2492 = vmatprep.subr.bf16.mxu1 %v2763_v50  ;;  %v526_v34 = vsel %vm442_vm1, %v521_v60, %v525_v45  ;;  %v2358_v45 = vcombine.low %v2286_v61, %v3402_v37  ;;  %v761_v37 = vshrl.u32 %v3466_v52, 16  ;;  %v533_v1 = vor.u32 %v532_v36, %v528_v25  ;;  %s2058_s24 = sshll.u32 %s3862_s21, 4  ;;  %p4015_p12 = scmp.ne.s32.totalorder %s4010_s30, 0  ;;  %s3907_s24 = int_to_ptr.vmem [resolvable:$true] %s2058_s24 }
  0xa7   : > { %2493 = vmatpush3.bf16.msra.mxu1 %v2765_v20  ;;  %v765_v61 = vrot.slane %v763_v59, 1  ;;  %vm1199_vm5 = vcmask 261120   ;;  %vm1241_vm6 = vcmask 392192   ;;  %vm1258_vm7 = vcmask 982016  }
  0xa8   : > { %1056 = vrot.lane.b32.xlu0 %v991_v57, %s3003_s5  ;;  %v1005_v57 = vshrl.u32 %v3508_v40, 16  ;;  %v538_v12 = vsel %vm442_vm1, %v533_v1, %v537_v18  ;;  %2494 = vmatprep.subr.bf16.mxu1 %v2767_v42  ;;  %v2770_v1 = vld [vmem:[#allocation5 + $0x38] sm:$0xff]   ;;  %vm1216_vm8 = vcmask 850944   ;;  %vm1656_vm9 = vcmask 1043456  }
  0xa9   : > { %866 = vrot.lane.b32.xlu1 %v847_v8, %s3000_s22  ;;  %v849_v8 = vrot.slane %v3487_v14, 1  ;;  %v1009_v14 = vrot.slane %v1007_v51, 1  ;;  %v602_v51 = vrot.slane %v3504_v35, 1  ;;  %v2345_v35 = vcombine.low %v2270_v31, %v3563_v47 }
  0xaa   : > { %v766_v16 = vor.u32 %v765_v61, %v761_v37  ;;  %v777_v37 = vrot.slane %v775_v3, 1  ;;  %v2774_v3 = vld [vmem:[#allocation5 + $0xb0] sm:$0xff]   ;;  %v785_v61 = vshrl.u32 %v3572_v10, 16  ;;  %vm1283_vm10 = vcmask 523264  }
  0xab   : > { %v1019_v44 = vshll.u32 %v2345_v35, 16  ;;  %vm1639_vm11 = vcmask 64512  }
  0xac   : > { %614 = vrot.lane.b32.xlu0 %v597_v23, %s2998_s25  ;;  %v2315_v23 = vcombine.low %v305_v0, %v289_v28  ;;  %v754_v28 = vor.u32 %v753_v26, %v749_v4  ;;  %v1095_v4 = vrot.slane %v2357_v17, 1  ;;  %v850_v26 = vsel %vm579_vm0, %v3481_v62, %v849_v8  ;;  %v2258_v0 = vld [vmem:[%s3233_s10 + $0x54] sm:$0xe]  ;;  %v2272_v62 = vld [vmem:[%s3233_s10 + $0x60] sm:$0xf] }
  0xad   : > { %670 = vrot.lane.b32.xlu1 %v3466_v52, %s2997_s23  ;;  %v1010_v8 = vor.u32 %v1009_v14, %v1005_v57  ;;  %v2338_v25 = vcombine.low %v2258_v0, %v3516_v49  ;;  %v2739_v49 = vld [vmem:[%s3233_s10 + $0x5c] ss:$0 sps:$4 sm:$0x11]   ;;  %v1026_v17 = vrot.slane %v1024_v15, 1 }
  0xae   : > { %v601_v38 = vrot.slane %v2315_v23, 1  ;;  %v759_v43 = vsel %vm442_vm1, %v754_v28, %v758_v19  ;;  %v3589_v60 = vsel %vm579_vm0, %v1095_v4, %v1096_v32  ;;  %v1098_v19 = vrot.slane %v2358_v45, 1  ;;  %v3615_v52 = vld [vmem:[%s3233_s10 + $0x68] ss:$0 sps:$4 sm:$0x11]  }
  0xaf   : > { %v854_v31 = vrot.slane %v2338_v25, 1  ;;  %v855_v20 = vrot.slane %v2739_v49, 1  ;;  %v1036_v45 = vshll.u32 %v3615_v52, 16  ;;  %v2768_v4 = vld [vmem:[#allocation5 + $0x78] sm:$0xff]   ;;  %v780_v0 = vshll.u32 %v2739_v49, 16 }
  0xb0   : > { %922 = vrot.lane.b32.xlu0 %v3448_v30, %s2999_s27  ;;  %v1012_v30 = vshll.u32 %v3524_v53, 16  ;;  %v603_v36 = vsel %vm579_vm0, %v601_v38, %v602_v51  ;;  %v2743_v32 = vld [vmem:[%s3233_s10 + $0x68] ss:$0 sps:$4 sm:$0x11]  }
  0xb1   : > { %1058 = vrot.lane.b32.xlu1 %v1003_v54, %s3003_s5  ;;  %v3567_v54 = vsel %vm579_vm0, %v1092_v39, %v1093_v41  ;;  %v2259_v39 = vld [vmem:[%s3233_s10 + $0x60] sm:$0xe]  ;;  %v856_v25 = vsel %vm579_vm0, %v854_v31, %v855_v20  ;;  %v2776_v31 = vld [vmem:[#allocation5 + $0xb8] sm:$0xff]  }
  0xb2   : > { %v1014_v50 = vrot.slane %v1012_v30, 1  ;;  %v1017_v30 = vshrl.u32 %v2345_v35, 16  ;;  %v2339_v38 = vcombine.low %v2259_v39, %v3552_v27  ;;  %v2288_v39 = vld [vmem:[%s3233_s10 + $0x48] sm:$0xe] }
  0xb4   : > { %802 = vrot.lane.b32.xlu0 %v747_v2, %s3002_s14  ;;  %v787_v2 = vshll.u32 %v3572_v10, 16  ;;  %v1015_v18 = vsel %vm442_vm1, %v1010_v8, %v1014_v50  ;;  %v2766_v50 = vld [vmem:[#allocation5 + $0x30] sm:$0xff]   ;;  %v2771_v8 = vld [vmem:[#allocation5 + $0xe8] sm:$0xff]   ;;  %v857_v15 = vrot.slane %v2339_v38, 1 }
  0xb5   : > { %616 = vrot.lane.b32.xlu1 %v600_v5, %s2998_s25  ;;  %v768_v5 = vshll.u32 %v3529_v48, 16  ;;  %v1099_v48 = vrot.slane %v3426_v63, 1  ;;  %v1021_v63 = vrot.slane %v1019_v44, 1  ;;  %2435 = vmatpush3.bf16.msra.mxu0 %v2766_v50  ;;  %v1038_v44 = vrot.slane %v1036_v45, 1  ;;  %v2287_v38 = vld [vmem:[%s3233_s10 + $0x3c] sm:$0xe] }
  0xb6   : > { %2436 = vmatprep.subr.bf16.mxu0 %v2768_v4  ;;  %v789_v49 = vrot.slane %v787_v2, 1  ;;  %v2360_v50 = vcombine.low %v2288_v39, %v3494_v21  ;;  %v2359_v21 = vcombine.low %v2287_v38, %v3436_v7  ;;  %v2781_v38 = vld [vmem:[#allocation5 + $0x120] sm:$0xff]  }
  0xb7   : > { %v3607_v14 = vsel %vm579_vm0, %v1098_v19, %v1099_v48  ;;  %v770_v23 = vrot.slane %v768_v5, 1  ;;  %v1022_v41 = vor.u32 %v1021_v63, %v1017_v30  ;;  %v2274_v5 = vld [vmem:[%s3233_s10 + $0x6c] sm:$0xf]  ;;  %v2772_v19 = vld [vmem:[#allocation5 + $0xa8] sm:$0xff]  }
  0xb8   : > { %551 = vrot.lane.b32.xlu0 %v526_v34, %s3001_s11  ;;  %v773_v34 = vshrl.u32 %v3534_v56, 16  ;;  %v2773_v48 = vld [vmem:[#allocation5 + $0xf0] sm:$0xff]   ;;  %v2775_v63 = vld [vmem:[#allocation5 + $0xf8] sm:$0xff]   ;;  %v1101_v7 = vrot.slane %v2359_v21, 1 }
  0xb9   : > { %924 = vrot.lane.b32.xlu1 %v3508_v40, %s2999_s27  ;;  %v3594_v40 = vld [vmem:[%s3233_s10 + $0x64] sm:$0xf]  ;;  %v1027_v51 = vsel %vm442_vm1, %v1022_v41, %v1026_v17  ;;  %v771_v27 = vsel %vm442_vm1, %v766_v16, %v770_v23  ;;  %2437 = vmatpush3.bf16.msra.mxu0 %v2770_v1  ;;  %v3004_v17 = vmov 0   ;;  %v2289_v16 = vld [vmem:[%s3233_s10 + $0x54] sm:$0xe] }
  0xba   : > { %v2346_v57 = vcombine.low %v2272_v62, %v3594_v40  ;;  %v3634_v62 = vld [vmem:[%s3233_s10 + $0x70] sm:$0xf]  ;;  %v778_v30 = vor.u32 %v777_v37, %v773_v34  ;;  %1854 = vmatprep.subr.bf16.mxu0 %v3004_v17 }
  0xbc   : > { %868 = vrot.lane.b32.xlu0 %v850_v26, %s3000_s22  ;;  %v1031_v59 = vshll.u32 %v2346_v57, 16  ;;  %v1029_v28 = vshrl.u32 %v2346_v57, 16 }
  0xbd   : > { %804 = vrot.lane.b32.xlu1 %v759_v43, %s3002_s14  ;;  %v2769_v43 = vld [vmem:[#allocation5 + $0xa0] sm:$0xff]  }
  0xbe   : > { %v1033_v26 = vrot.slane %v1031_v59, 1  ;;  %2495 = vmatpush3.bf16.msra.mxu1 %v2769_v43  ;;  %v2291_v43 = vld [vmem:[%s3233_s10 + $0x6c] sm:$0xe] }
  0xbf   : > { %2496 = vmatprep.subr.bf16.mxu1 %v2771_v8  ;;  %v2363_v1 = vcombine.low %v2291_v43, %v3634_v62  ;;  %v1108_v8 = vrot.slane %v3575_v6, 1 }
  0xc0   : > { %672 = vrot.lane.b32.xlu0 %v3534_v56, %s2997_s23  ;;  %v858_v56 = vrot.slane %v2743_v32, 1 }
  0xc1   : > { %553 = vrot.lane.b32.xlu1 %v538_v12, %s3001_s11  ;;  %v1034_v12 = vor.u32 %v1033_v26, %v1029_v28  ;;  %v1104_v26 = vrot.slane %v2360_v50, 1  ;;  %s3007_s11 = smov [#allocation8]  }
  0xc2   : > { %2497 = vmatpush3.bf16.msra.mxu1 %v2772_v19  ;;  %v1113_v19 = vrot.slane %v2363_v1, 1 }
  0xc3   : > { %2498 = vmatprep.subr.bf16.mxu1 %v2773_v48  ;;  %v1039_v23 = vsel %vm442_vm1, %v1034_v12, %v1038_v44 }
  0xc4   : > { %1060 = vrot.lane.b32.xlu0 %v1015_v18, %s3003_s5  ;;  %v2347_v18 = vcombine.low %v2274_v5, %v3634_v62 }
  0xc5   : > { %870 = vrot.lane.b32.xlu1 %v853_v24, %s3000_s22  ;;  %v792_v24 = vshll.u32 %v2743_v32, 16  ;;  %v1105_v32 = vrot.slane %v3524_v53, 1 }
  0xc6   : > { %2499 = vmatpush3.bf16.msra.mxu1 %v2774_v3  ;;  %v1043_v34 = vshll.u32 %v2347_v18, 16  ;;  %v1041_v41 = vshrl.u32 %v2347_v18, 16 }
  0xc7   : > { %2500 = vmatprep.subr.bf16.mxu1 %v2775_v63  ;;  %v794_v2 = vrot.slane %v792_v24, 1  ;;  %v1106_v5 = vsel %vm579_vm0, %v1104_v26, %v1105_v32 }
  0xc8   : > { %618 = vrot.lane.b32.xlu0 %v603_v36, %s2998_s25  ;;  %v790_v36 = vor.u32 %v789_v49, %v785_v61  ;;  %v1045_v20 = vrot.slane %v1043_v34, 1  ;;  %v2777_v61 = vld [vmem:[#allocation5 + $0x100] sm:$0xff]   ;;  %s3905_s25 = scalar_lea.hbm %s3997_s3, %s2421_s29 }
  0xc9   : > { %674 = vrot.lane.b32.xlu1 %v3572_v10, %s2997_s23  ;;  %v859_v10 = vsel %vm579_vm0, %v857_v15, %v858_v56  ;;  %v1111_v15 = vrot.slane %v3615_v52, 1 }
  0xca   : > { %2501 = vmatpush3.bf16.msra.mxu1 %v2776_v31  ;;  %v795_v42 = vsel %vm442_vm1, %v790_v36, %v794_v2  ;;  %v1046_v45 = vor.u32 %v1045_v20, %v1041_v41  ;;  %v2778_v31 = vld [vmem:[#allocation5 + $0x108] sm:$0xff]  }
  0xcb   : > { %2550 = vmatprep.subr.bf16.mxu1 %v3004_v17 }
  0xcc   : > { %926 = vrot.lane.b32.xlu0 %v2345_v35, %s2999_s27  ;;  %v782_v35 = vrot.slane %v780_v0, 1  ;;  %v2290_v0 = vld [vmem:[%s3233_s10 + $0x60] sm:$0xe] }
  0xcd   : > { %1062 = vrot.lane.b32.xlu1 %v1027_v51, %s3003_s5  ;;  %v2361_v51 = vcombine.low %v2289_v16, %v3563_v47  ;;  %v2362_v53 = vcombine.low %v2290_v0, %v3594_v40 }
  0xce   : > { %v783_v59 = vsel %vm442_vm1, %v778_v30, %v782_v35 }
  0xcf   : > { %v1107_v47 = vrot.slane %v2361_v51, 1  ;;  %v1110_v40 = vrot.slane %v2362_v53, 1 }
  0xd0   : > { %806 = vrot.lane.b32.xlu0 %v771_v27, %s3002_s14 }
  0xd1   : > { %928 = vrot.lane.b32.xlu1 %v2346_v57, %s2999_s27  ;;  %v2754_v57 = vld [vmem:[%s3233_s10 + $0x74] ss:$0 sps:$4 sm:$0x11]   ;;  %v1109_v62 = vsel %vm579_vm0, %v1107_v47, %v1108_v8  ;;  %v1112_v56 = vsel %vm579_vm0, %v1110_v40, %v1111_v15 }
  0xd2   : > { %v1048_v28 = vshll.u32 %v2754_v57, 16  ;;  %v1114_v12 = vrot.slane %v2754_v57, 1 }
  0xd4   : > { %872 = vrot.lane.b32.xlu0 %v856_v25, %s3000_s22  ;;  %v1050_v4 = vrot.slane %v1048_v28, 1 }
  0xd5   : > { %1064 = vrot.lane.b32.xlu1 %v1039_v23, %s3003_s5 }
  0xd8   : > { %808 = vrot.lane.b32.xlu0 %v783_v59, %s3002_s14 }
  0xd9   : > { %874 = vrot.lane.b32.xlu1 %v859_v10, %s3000_s22  ;;  %v2779_v10 = vld [vmem:[#allocation5 + $0x110] sm:$0xff]   ;;  %s2872_s22 = scalar_lea.vmem %s3907_s24, 2048 }
  0xda   : > { %p2873_p8 = scmp.ne.s32.totalorder %s3907_s24, %s2872_s22 }
  0xdc   : > { %1116 = vrot.lane.b32.xlu0 %v3567_v54, %s3005_s9  ;;  %v1051_v54 = vsel %vm442_vm1, %v1046_v45, %v1050_v4  ;;  %p2874_p1 = pnand %p2873_p8, %p4015_p12 }
  0xdd   : > { %810 = vrot.lane.b32.xlu1 %v795_v42, %s3002_s14  ;;  %v2780_v42 = vld [vmem:[#allocation5 + $0x118] sm:$0xff]   ;;  %s2876_s14 = sshll.u32 %s3007_s11, 4  ;;  %s2877_s14 = int_to_ptr.vmem [resolvable:$false] %s2876_s14 }
  0xde   : > { %p2875_p10 = pneg %p2874_p1  ;;  %p2879_p3 = scmp.lt.s32.totalorder %s3907_s24, %s2877_s14 }
  0xe0   : > { %930 = vrot.lane.b32.xlu0 %v2347_v18, %s2999_s27  ;;  %s2037_s27 = scalar_lea.sflag [#allocation4], %s3229_s13 }
  0xe1   : > { %1118 = vrot.lane.b32.xlu1 %v3589_v60, %s3005_s9  ;;  %v1102_v60 = vrot.slane %v3452_v33, 1  ;;  %v1115_v33 = vsel %vm579_vm0, %v1113_v19, %v1114_v12 }
  0xe3   : > { %v661_v37 = vpop.permute.xlu1 %660  ;;  %v1103_v6 = vsel %vm579_vm0, %v1101_v7, %v1102_v60  ;;  %v2784_v60 = vld [vmem:[#allocation5 + $0x138] sm:$0xff]  }
  0xe4   : > { %1066 = vrot.lane.b32.xlu0 %v1051_v54, %s3003_s5  ;;  %v2782_v54 = vld [vmem:[#allocation5 + $0x128] sm:$0xff]   ;;  %s2878_s5 = scalar_lea.vmem %s2877_s14, 4096 }
  0xe5   : > { %1124 = vrot.lane.b32.xlu1 %v1106_v5, %s3005_s9  ;;  %v2783_v5 = vld [vmem:[#allocation5 + $0x130] sm:$0xff]   ;;  %p2880_p5 = scmp.lt.s32.totalorder %s2878_s5, %s2872_s22 }
  0xe6   : > { %v605_v27 = vpop.permute.xlu0 %604 }
  0xe7   : > { %v3679_v44 = vpop.permute.xlu1 %662  ;;  %p2881_p9 = por %p2880_p5, %p2879_p3 }
  0xe8   : > { %1120 = vrot.lane.b32.xlu0 %v3607_v14, %s3005_s9 }
  0xe9   : > { %1126 = vrot.lane.b32.xlu1 %v1109_v62, %s3005_s9  ;;  %p2882_p2 = pnand %p2881_p9, %p2875_p10 }
  0xea   : > { %v607_v48 = vpop.permute.xlu0 %606 }
  0xeb   : > { %v917_v35 = vpop.permute.xlu1 %916 }
  0xec   : > { %1122 = vrot.lane.b32.xlu0 %v1103_v6, %s3005_s9 }
  0xed   : > { %1130 = vrot.lane.b32.xlu1 %v1115_v33, %s3005_s9 }
  0xee   : > { %v861_v3 = vpop.permute.xlu0 %860 }
  0xef   : > { %v609_v25 = vpop.permute.xlu1 %608  ;;  %v1243_v39 = vsel %vm1241_vm6, %v861_v3, %v917_v35 }
  0xf0   : > { %1128 = vrot.lane.b32.xlu0 %v1112_v56, %s3005_s9 }
  0xf2   : > { %v540_v14 = vpop.permute.xlu0 %539 }
  0xf3   : > { %v1159_v52 = vsel %vm1157_vm2, %v540_v14, %v605_v27  ;;  %v542_v30 = vpop.permute.xlu1 %541  ;;  %v1134_v23 = vsel %vm1132_vm4, %v3254_v11, %v540_v14  ;;  %v2785_v27 = vld [vmem:[#allocation5 + $0x140] ss:$0 sps:$4 sm:$0xff]  }
  0xf4   : > { %v1161_v18 = vsel %vm1157_vm2, %v542_v30, %v607_v48  ;;  %v1176_v63 = vsel %vm1174_vm3, %v1159_v52, %v661_v37  ;;  %v1137_v2 = vsel %vm1132_vm4, %v3278_v29, %v542_v30 }
  0xf5   : > { %1692 = vmatprep.mubr.bf16.mxu0 %v1176_v63  ;;  %v1179_v49 = vsel %vm1174_vm3, %v1161_v18, %v3679_v44 }
  0xf6   : > { %1693 = vmatmul.mubr.bf16.vlgmr.msra.gmra.mrb[0].mxu0 %v1134_v23  ;;  %v544_v24 = vpop.permute.xlu0 %543 }
  0xf7   : > { %v797_v57 = vpop.permute.xlu1 %796  ;;  %1700 = vmatprep.mubr.bf16.mxu0 %v1179_v49  ;;  %1855 = vmatpush1.bf16.msra.mxu0 %v2777_v61  ;;  %v1163_v11 = vsel %vm1157_vm2, %v544_v24, %v609_v25  ;;  %v1140_v51 = vsel %vm1132_vm4, %v3293_v46, %v544_v24 }
  0xf8   : > { %1856 = vmatprep.subr.bf16.mxu0 %v3004_v17  ;;  %v1201_v36 = vsel %vm1199_vm5, %v661_v37, %v797_v57 }
  0xf9   : > { %v1218_v16 = vsel %vm1216_vm8, %v1201_v36, %v861_v3 }
  0xfa   : > { %v3700_v59 = vpop.permute.xlu0 %664 }
  0xfb   : > { %v546_v34 = vpop.permute.xlu1 %545  ;;  %1857 = vmatpush1.bf16.msra.mxu0 %v2778_v31  ;;  %v1182_v20 = vsel %vm1174_vm3, %v1163_v11, %v3700_v59 }
  0xfc   : > { %1858 = vmatprep.subr.bf16.mxu0 %v3004_v17  ;;  %v1143_v8 = vsel %vm1132_vm4, %v3314_v9, %v546_v34  ;;  %v1658_v9 = vsel %vm1656_vm9, %v2785_v27, 0 }
  0xfe   : > { %1701 = vmatmul.mubr.bf16.gmra.mrb[4].mxu0 %v1137_v2  ;;  %v3708_v41 = vpop.permute.xlu0 %1052 }
  0xff   : > { %v863_v28 = vpop.permute.xlu1 %862  ;;  %1708 = vmatprep.mubr.bf16.mxu0 %v1182_v20  ;;  %v1260_v50 = vsel %vm1258_vm7, %v1243_v39, %v3708_v41  ;;  %1859 = vmatpush1.bf16.msra.mxu0 %v2779_v10 }
 0x100   : > { %1789 = vmatprep.mubr.bf16.mxu1 %v1260_v50  ;;  %1860 = vmatprep.subr.bf16.mxu0 %v3004_v17 }
 0x101   : > { %1790 = vmatmul.mubr.bf16.vlgmr.msra.gmra.mrb[0].mxu1 %v1218_v16 }
 0x102   : > { %v611_v29 = vpop.permute.xlu0 %610  ;;  %2559 = vmatpush1.bf16.msra.mxu1 %v2777_v61 }
 0x103   : > { %v1165_v45 = vsel %vm1157_vm2, %v546_v34, %v611_v29  ;;  %v3717_v4 = vpop.permute.xlu1 %666  ;;  %1861 = vmatpush1.bf16.msra.mxu0 %v2780_v42  ;;  %2551 = vmatprep.subr.bf16.mxu1 %v3004_v17 }
 0x104   : > { %1862 = vmatprep.subr.bf16.mxu0 %v3004_v17  ;;  %v1185_v32 = vsel %vm1174_vm3, %v1165_v45, %v3717_v4 }
 0x106   : > { %1709 = vmatmul.mubr.bf16.gmra.mrb[8].mxu0 %v1140_v51  ;;  %v919_v26 = vpop.permute.xlu0 %918  ;;  %2560 = vmatpush1.bf16.msra.mxu1 %v2778_v31 }
 0x107   : > { %v1245_v43 = vsel %vm1241_vm6, %v863_v28, %v919_v26  ;;  %v3726_v21 = vpop.permute.xlu1 %1054  ;;  %1716 = vmatprep.mubr.bf16.mxu0 %v1185_v32  ;;  %1863 = vmatpush1.bf16.msra.mxu0 %v2781_v38 }
 0x108   : > { %v1263_v0 = vsel %vm1258_vm7, %v1245_v43, %v3726_v21  ;;  %2552 = vmatprep.subr.bf16.mxu1 %v3004_v17  ;;  %1864 = vmatprep.subr.bf16.mxu0 %v3004_v17 }
 0x109   : > { %1797 = vmatprep.mubr.bf16.mxu1 %v1263_v0 }
 0x10a   : > { %v799_v46 = vpop.permute.xlu0 %798  ;;  %2561 = vmatpush1.bf16.msra.mxu1 %v2779_v10 }
 0x10b   : > { %v1203_v1 = vsel %vm1199_vm5, %v3679_v44, %v799_v46  ;;  %v613_v37 = vpop.permute.xlu1 %612  ;;  %1865 = vmatpush1.bf16.msra.mxu0 %v2782_v54  ;;  %2553 = vmatprep.subr.bf16.mxu1 %v3004_v17 }
 0x10c   : > { %v1221_v47 = vsel %vm1216_vm8, %v1203_v1, %v863_v28  ;;  %1866 = vmatprep.subr.bf16.mxu0 %v3004_v17 }
 0x10d   : > { %1798 = vmatmul.mubr.bf16.gmra.mrb[4].mxu1 %v1221_v47 }
 0x10e   : > { %1717 = vmatmul.mubr.bf16.gmra.mrb[12].mxu0 %v1143_v8  ;;  %v548_v53 = vpop.permute.xlu0 %547  ;;  %2562 = vmatpush1.bf16.msra.mxu1 %v2780_v42 }
 0x10f   : > { %v921_v7 = vpop.permute.xlu1 %920  ;;  %1867 = vmatpush1.bf16.msra.mxu0 %v2783_v5  ;;  %2554 = vmatprep.subr.bf16.mxu1 %v3004_v17  ;;  %v1167_v19 = vsel %vm1157_vm2, %v548_v53, %v613_v37  ;;  %v1146_v15 = vsel %vm1132_vm4, %v3366_v58, %v548_v53 }
 0x110   : > { %1868 = vmatprep.subr.bf16.mxu0 %v3004_v17 }
 0x112   : > { %v865_v44 = vpop.permute.xlu0 %864  ;;  %2563 = vmatpush1.bf16.msra.mxu1 %v2781_v38 }
 0x113   : > { %v801_v62 = vpop.permute.xlu1 %800  ;;  %1869 = vmatpush1.bf16.msra.mxu0 %v2784_v60  ;;  %2555 = vmatprep.subr.bf16.mxu1 %v3004_v17  ;;  %v1247_v35 = vsel %vm1241_vm6, %v865_v44, %v921_v7 }
 0x114   : > { %1870 = vmatprep.subr.bf16.mxu0 %v3004_v17  ;;  %v1205_v48 = vsel %vm1199_vm5, %v3700_v59, %v801_v62 }
 0x115   : > { %v1224_v25 = vsel %vm1216_vm8, %v1205_v48, %v865_v44 }
 0x116   : > { %v669_v12 = vpop.permute.xlu0 %668  ;;  %2564 = vmatpush1.bf16.msra.mxu1 %v2782_v54 }
 0x117   : > { %v550_v6 = vpop.permute.xlu1 %549  ;;  %v1188_v40 = vsel %vm1174_vm3, %v1167_v19, %v669_v12  ;;  %1871 = vmatpush1.bf16.msra.mxu0 %v1658_v9  ;;  %2556 = vmatprep.subr.bf16.mxu1 %v3004_v17 }
 0x118   : > { %1724 = vmatprep.mubr.bf16.mxu0 %v1188_v40  ;;  %v1149_v61 = vsel %vm1132_vm4, %v3398_v13, %v550_v6 }
 0x119   : > { %1725 = vmatmul.mubr.bf16.gmra.mrb[16].mxu0 %v1146_v15 }
 0x11a   : > { %v3751_v33 = vpop.permute.xlu0 %1056  ;;  %2565 = vmatpush1.bf16.msra.mxu1 %v2783_v5 }
 0x11b   : > { %v867_v56 = vpop.permute.xlu1 %866  ;;  %v1266_v3 = vsel %vm1258_vm7, %v1247_v35, %v3751_v33  ;;  %2557 = vmatprep.subr.bf16.mxu1 %v3004_v17 }
 0x11c   : > { %1805 = vmatprep.mubr.bf16.mxu1 %v1266_v3 }
 0x11d   : > { %1806 = vmatmul.mubr.bf16.gmra.mrb[8].mxu1 %v1224_v25 }
 0x11e   : > { %v615_v58 = vpop.permute.xlu0 %614  ;;  %2566 = vmatpush1.bf16.msra.mxu1 %v2784_v60 }
 0x11f   : > { %v1169_v14 = vsel %vm1157_vm2, %v550_v6, %v615_v58  ;;  %v671_v52 = vpop.permute.xlu1 %670  ;;  %2558 = vmatprep.subr.bf16.mxu1 %v3004_v17 }
 0x120   : > { %v1191_v30 = vsel %vm1174_vm3, %v1169_v14, %v671_v52 }
 0x121   : > { %1732 = vmatprep.mubr.bf16.mxu0 %v1191_v30 }
 0x122   : > { %1733 = vmatmul.mubr.bf16.gmra.mrb[20].mxu0 %v1149_v61  ;;  %v923_v18 = vpop.permute.xlu0 %922  ;;  %2567 = vmatpush1.bf16.msra.mxu1 %v1658_v9 }
 0x123   : > { %v1249_v63 = vsel %vm1241_vm6, %v867_v56, %v923_v18  ;;  %v3763_v23 = vpop.permute.xlu1 %1058 }
 0x124   : > { %v1269_v49 = vsel %vm1258_vm7, %v1249_v63, %v3763_v23 }
 0x125   : > { %1813 = vmatprep.mubr.bf16.mxu1 %v1269_v49 }
 0x126   : > { %v803_v24 = vpop.permute.xlu0 %802 }
 0x127   : > { %v1207_v17 = vsel %vm1199_vm5, %v3717_v4, %v803_v24  ;;  %v617_v57 = vpop.permute.xlu1 %616 }
 0x128   : > { %v1227_v31 = vsel %vm1216_vm8, %v1207_v17, %v867_v56 }
 0x129   : > { %1814 = vmatmul.mubr.bf16.gmra.mrb[12].mxu1 %v1227_v31 }
 0x12a   : > { %v552_v13 = vpop.permute.xlu0 %551 }
 0x12b   : > { %v925_v59 = vpop.permute.xlu1 %924  ;;  %v1171_v11 = vsel %vm1157_vm2, %v552_v13, %v617_v57  ;;  %v1152_v20 = vsel %vm1132_vm4, %v3470_v55, %v552_v13 }
 0x12e   : > { %v869_v34 = vpop.permute.xlu0 %868 }
 0x12f   : > { %v805_v10 = vpop.permute.xlu1 %804  ;;  %v1251_v50 = vsel %vm1241_vm6, %v869_v34, %v925_v59 }
 0x130   : > { %v1209_v28 = vsel %vm1199_vm5, %v669_v12, %v805_v10  ;;  %v3815_v10 = vld [vmem:[#allocation7] ss:$0 sm:$0xff] }
 0x131   : > { %v1230_v45 = vsel %vm1216_vm8, %v1209_v28, %v869_v34 }
 0x132   : > { %v673_v36 = vpop.permute.xlu0 %672 }
 0x133   : > { %v554_v2 = vpop.permute.xlu1 %553  ;;  %v1194_v39 = vsel %vm1174_vm3, %v1171_v11, %v673_v36 }
 0x134   : > { %1740 = vmatprep.mubr.bf16.mxu0 %v1194_v39  ;;  %v1155_v55 = vsel %vm1132_vm4, %v3521_v22, %v554_v2 }
 0x135   : > { %1741 = vmatmul.mubr.bf16.gmra.mrb[24].mxu0 %v1152_v20 }
 0x136   : > { %v1061_v42 = vpop.permute.xlu0 %1060 }
 0x137   : > { %v871_v16 = vpop.permute.xlu1 %870  ;;  %v1272_v29 = vsel %vm1258_vm7, %v1251_v50, %v1061_v42 }
 0x138   : > { %1821 = vmatprep.mubr.bf16.mxu1 %v1272_v29 }
 0x139   : > { %1822 = vmatmul.mubr.bf16.gmra.mrb[16].mxu1 %v1230_v45 }
 0x13a   : > { %v619_v4 = vpop.permute.xlu0 %618 }
 0x13b   : > { %v1173_v38 = vsel %vm1157_vm2, %v554_v2, %v619_v4  ;;  %v675_v51 = vpop.permute.xlu1 %674  ;;  %v3006_v2 = vmov 0.0  }
 0x13c   : > { %v1197_v26 = vsel %vm1174_vm3, %v1173_v38, %v675_v51  ;;  %1971 = vst [vmem:[%s3817_s8] sm:$0x3] %v3006_v2 }
 0x13d   : > { %1748 = vmatprep.mubr.bf16.mxu0 %v1197_v26 }
 0x13e   : > { %1749 = vmatmul.mubr.bf16.gmra.mrb[28].mxu0 %v1155_v55  ;;  %v927_v32 = vpop.permute.xlu0 %926 }
 0x13f   : > { %v1253_v43 = vsel %vm1241_vm6, %v871_v16, %v927_v32  ;;  %v1063_v54 = vpop.permute.xlu1 %1062 }
 0x140   : > { %v1275_v0 = vsel %vm1258_vm7, %v1253_v43, %v1063_v54 }
 0x141   : > { %1829 = vmatprep.mubr.bf16.mxu1 %v1275_v0 }
 0x142   : > { %v807_v46 = vpop.permute.xlu0 %806 }
 0x143   : > { %v1211_v1 = vsel %vm1199_vm5, %v671_v52, %v807_v46  ;;  %v929_v37 = vpop.permute.xlu1 %928 }
 0x144   : > { %v1233_v5 = vsel %vm1216_vm8, %v1211_v1, %v871_v16 }
 0x145   : > { %1830 = vmatmul.mubr.bf16.gmra.mrb[20].mxu1 %v1233_v5 }
 0x146   : > { %v873_v47 = vpop.permute.xlu0 %872 }
 0x147   : > { %v1255_v8 = vsel %vm1241_vm6, %v873_v47, %v929_v37  ;;  %v1065_v53 = vpop.permute.xlu1 %1064 }
 0x148   : > { %v1278_v22 = vsel %vm1258_vm7, %v1255_v8, %v1065_v53 }
 0x149   : > { %1837 = vmatprep.mubr.bf16.mxu1 %v1278_v22 }
 0x14a   : > { %v809_v7 = vpop.permute.xlu0 %808 }
 0x14b   : > { %v1213_v60 = vsel %vm1199_vm5, %v673_v36, %v809_v7  ;;  %v875_v27 = vpop.permute.xlu1 %874 }
 0x14c   : > { %v1236_v44 = vsel %vm1216_vm8, %v1213_v60, %v873_v47 }
 0x14d   : > { %1838 = vmatmul.mubr.bf16.gmra.mrb[24].mxu1 %v1236_v44 }
 0x14e   : > { %v1117_v62 = vpop.permute.xlu0 %1116 }
 0x14f   : > { %v1285_v9 = vsel %vm1283_vm10, %v3708_v41, %v1117_v62  ;;  %v811_v19 = vpop.permute.xlu1 %810  ;;  %2406 = vmatprep.mubr.msk.bf16.mxu0 %vm1639_vm11, %v1117_v62 }
 0x150   : > { %1887 = vmatmul.mubr.bf16.vlgmr.msra.gmra.mrb[32].mxu0 %v1285_v9  ;;  %v1215_v40 = vsel %vm1199_vm5, %v675_v51, %v811_v19 }
 0x151   : > { %v1239_v41 = vsel %vm1216_vm8, %v1215_v40, %v875_v27 }
 0x152   : > { %v931_v12 = vpop.permute.xlu0 %930 }
 0x153   : > { %v1119_v6 = vpop.permute.xlu1 %1118  ;;  %v1257_v15 = vsel %vm1241_vm6, %v875_v27, %v931_v12 }
 0x154   : > { %2407 = vmatprep.mubr.msk.bf16.mxu0 %vm1639_vm11, %v1119_v6  ;;  %v1288_v56 = vsel %vm1283_vm10, %v3726_v21, %v1119_v6 }
 0x156   : > { %v1067_v48 = vpop.permute.xlu0 %1066 }
 0x157   : > { %v1281_v35 = vsel %vm1258_vm7, %v1257_v15, %v1067_v48  ;;  %v1125_v3 = vpop.permute.xlu1 %1124 }
 0x158   : > { %1845 = vmatprep.mubr.bf16.mxu1 %v1281_v35  ;;  %1895 = vmatmul.mubr.bf16.gmra.mrb[36].mxu0 %v1288_v56  ;;  %v1297_v14 = vsel %vm1283_vm10, %v1061_v42, %v1125_v3 }
 0x159   : > { %1846 = vmatmul.mubr.bf16.gmra.mrb[28].mxu1 %v1239_v41 }
 0x15a   : > { %v1121_v25 = vpop.permute.xlu0 %1120  ;;  %2410 = vmatprep.mubr.msk.bf16.mxu1 %vm1639_vm11, %v1125_v3 }
 0x15b   : > { %2408 = vmatprep.mubr.msk.bf16.mxu0 %vm1639_vm11, %v1121_v25  ;;  %v1291_v58 = vsel %vm1283_vm10, %v3751_v33, %v1121_v25  ;;  %v1127_v30 = vpop.permute.xlu1 %1126 }
 0x15c   : > { %v1300_v61 = vsel %vm1283_vm10, %v1063_v54, %v1127_v30 }
 0x15e   : > { %v1123_v52 = vpop.permute.xlu0 %1122 }
 0x15f   : > { %v1294_v21 = vsel %vm1283_vm10, %v3763_v23, %v1123_v52  ;;  %v1131_v63 = vpop.permute.xlu1 %1130 }
 0x160   : > { %1903 = vmatmul.mubr.bf16.gmra.mrb[40].mxu0 %v1291_v58  ;;  %v1306_v49 = vsel %vm1283_vm10, %v1067_v48, %v1131_v63 }
 0x161   : > { %1919 = vmatmul.mubr.bf16.vlgmr.msra.gmra.mrb[32].mxu1 %v1297_v14  ;;  %2409 = vmatprep.mubr.msk.bf16.mxu0 %vm1639_vm11, %v1123_v52 }
 0x162   : > { %2411 = vmatprep.mubr.msk.bf16.mxu1 %vm1639_vm11, %v1127_v30  ;;  %v1129_v18 = vpop.permute.xlu0 %1128 }
 0x163   : > { %v1303_v33 = vsel %vm1283_vm10, %v1065_v53, %v1129_v18 }
 0x168   : > { %1911 = vmatmul.mubr.bf16.gmra.mrb[44].mxu0 %v1294_v21 }
 0x169   : > { %1927 = vmatmul.mubr.bf16.gmra.mrb[36].mxu1 %v1300_v61 }
 0x16a   : > { %2412 = vmatprep.mubr.msk.bf16.mxu1 %vm1639_vm11, %v1129_v18 }
 0x171   : > { %1935 = vmatmul.mubr.bf16.gmra.mrb[40].mxu1 %v1303_v33 }
 0x172   : > { %2413 = vmatprep.mubr.msk.bf16.mxu1 %vm1639_vm11, %v1131_v63 }
 0x179   : > { %1943 = vmatmul.mubr.bf16.gmra.mrb[44].mxu1 %v1306_v49 }
 0x1c9   : > { %v2438_v24 = vpop.f32.mrb[0].mxu0 }
 0x1ca   : > { %v2439_v17 = vpop.f32.mrb[1].mxu0 }
 0x1cb   : > { %v2440_v23 = vadd.f32 %v2439_v17, %v2438_v24  ;;  %v2441_v57 = vpop.f32.mrb[2].mxu0 }
 0x1cc   : > { %v2442_v31 = vpop.f32.mrb[3].mxu0 }
 0x1cd   : > { %v2443_v13 = vadd.f32 %v2442_v31, %v2441_v57  ;;  %v1695_v42 = vadd.f32 %v2440_v23, %v3815_v10 }
 0x1cf   : > { %v1698_v4 = vadd.f32 %v2443_v13, %v3815_v10 }
 0x1d1   : > { %v2444_v59 = vpop.f32.mrb[4].mxu0 }
 0x1d2   : > { %v2445_v34 = vpop.f32.mrb[5].mxu0 }
 0x1d3   : > { %v2446_v11 = vadd.f32 %v2445_v34, %v2444_v59  ;;  %v2447_v36 = vpop.f32.mrb[6].mxu0 }
 0x1d4   : > { %v2448_v39 = vpop.f32.mrb[7].mxu0  ;;  %v2502_v20 = vpop.f32.mrb[0].mxu1 }
 0x1d5   : > { %v2449_v28 = vadd.f32 %v2448_v39, %v2447_v36  ;;  %v2503_v50 = vpop.f32.mrb[1].mxu1  ;;  %v1703_v47 = vadd.f32 %v2446_v11, %v3815_v10 }
 0x1d6   : > { %v2504_v16 = vadd.f32 %v2503_v50, %v2502_v20  ;;  %v2505_v29 = vpop.f32.mrb[2].mxu1 }
 0x1d7   : > { %v2506_v45 = vpop.f32.mrb[3].mxu1  ;;  %v1706_v44 = vadd.f32 %v2449_v28, %v3815_v10 }
 0x1d8   : > { %v2507_v38 = vadd.f32 %v2506_v45, %v2505_v29  ;;  %v3822_v51 = vadd.f32 %v2504_v16, %v1695_v42 }
 0x1d9   : > { %v2450_v26 = vpop.f32.mrb[8].mxu0 }
 0x1da   : > { %v2451_v55 = vpop.f32.mrb[9].mxu0  ;;  %v3824_v32 = vadd.f32 %v2507_v38, %v1698_v4 }
 0x1db   : > { %v2452_v43 = vadd.f32 %v2451_v55, %v2450_v26  ;;  %v2453_v54 = vpop.f32.mrb[10].mxu0 }
 0x1dc   : > { %v2454_v0 = vpop.f32.mrb[11].mxu0 }
 0x1dd   : > { %v2455_v46 = vadd.f32 %v2454_v0, %v2453_v54  ;;  %v1711_v58 = vadd.f32 %v2452_v43, %v3815_v10 }
 0x1df   : > { %v1714_v21 = vadd.f32 %v2455_v46, %v3815_v10 }
 0x1e0   : > { %v2508_v1 = vpop.f32.mrb[4].mxu1 }
 0x1e1   : > { %v2456_v37 = vpop.f32.mrb[12].mxu0  ;;  %v2509_v5 = vpop.f32.mrb[5].mxu1 }
 0x1e2   : > { %v2510_v8 = vadd.f32 %v2509_v5, %v2508_v1  ;;  %v2457_v53 = vpop.f32.mrb[13].mxu0  ;;  %v2511_v22 = vpop.f32.mrb[6].mxu1 }
 0x1e3   : > { %v2458_v7 = vadd.f32 %v2457_v53, %v2456_v37  ;;  %v2459_v60 = vpop.f32.mrb[14].mxu0  ;;  %v2512_v27 = vpop.f32.mrb[7].mxu1 }
 0x1e4   : > { %v2513_v62 = vadd.f32 %v2512_v27, %v2511_v22  ;;  %v2460_v9 = vpop.f32.mrb[15].mxu0  ;;  %v3828_v19 = vadd.f32 %v2510_v8, %v1703_v47 }
 0x1e5   : > { %v2461_v12 = vadd.f32 %v2460_v9, %v2459_v60  ;;  %v1719_v59 = vadd.f32 %v2458_v7, %v3815_v10 }
 0x1e6   : > { %v3830_v6 = vadd.f32 %v2513_v62, %v1706_v44 }
 0x1e7   : > { %v1722_v2 = vadd.f32 %v2461_v12, %v3815_v10 }
 0x1ec   : > { %v2462_v40 = vpop.f32.mrb[16].mxu0 }
 0x1ed   : > { %v2463_v15 = vpop.f32.mrb[17].mxu0 }
 0x1ee   : > { %v2464_v48 = vadd.f32 %v2463_v15, %v2462_v40  ;;  %v2465_v35 = vpop.f32.mrb[18].mxu0 }
 0x1ef   : > { %v2466_v56 = vpop.f32.mrb[19].mxu0 }
 0x1f0   : > { %v2467_v41 = vadd.f32 %v2466_v56, %v2465_v35  ;;  %v2514_v3 = vpop.f32.mrb[8].mxu1  ;;  %v1727_v55 = vadd.f32 %v2464_v48, %v3815_v10 }
 0x1f1   : > { %v2515_v25 = vpop.f32.mrb[9].mxu1 }
 0x1f2   : > { %v2516_v14 = vadd.f32 %v2515_v25, %v2514_v3  ;;  %v2517_v52 = vpop.f32.mrb[10].mxu1  ;;  %v1730_v46 = vadd.f32 %v2467_v41, %v3815_v10 }
 0x1f3   : > { %v2518_v30 = vpop.f32.mrb[11].mxu1 }
 0x1f4   : > { %v2519_v61 = vadd.f32 %v2518_v30, %v2517_v52  ;;  %v3834_v18 = vadd.f32 %v2516_v14, %v1711_v58 }
 0x1f5   : > { %v2468_v33 = vpop.f32.mrb[20].mxu0 }
 0x1f6   : > { %v2469_v63 = vpop.f32.mrb[21].mxu0  ;;  %v3836_v49 = vadd.f32 %v2519_v61, %v1714_v21 }
 0x1f7   : > { %v2470_v24 = vadd.f32 %v2469_v63, %v2468_v33  ;;  %v2471_v17 = vpop.f32.mrb[22].mxu0 }
 0x1f8   : > { %v2472_v23 = vpop.f32.mrb[23].mxu0 }
 0x1f9   : > { %v2473_v57 = vadd.f32 %v2472_v23, %v2471_v17  ;;  %v1735_v62 = vadd.f32 %v2470_v24, %v3815_v10 }
 0x1fb   : > { %v1738_v15 = vadd.f32 %v2473_v57, %v3815_v10 }
 0x1fc   : > { %v2520_v31 = vpop.f32.mrb[12].mxu1 }
 0x1fd   : > { %v2521_v13 = vpop.f32.mrb[13].mxu1 }
 0x1fe   : > { %v2522_v34 = vadd.f32 %v2521_v13, %v2520_v31  ;;  %v2523_v11 = vpop.f32.mrb[14].mxu1 }
 0x1ff   : > { %v2524_v36 = vpop.f32.mrb[15].mxu1 }
 0x200   : > { %v2525_v39 = vadd.f32 %v2524_v36, %v2523_v11  ;;  %v3840_v20 = vadd.f32 %v2522_v34, %v1719_v59 }
 0x202   : > { %v3842_v28 = vadd.f32 %v2525_v39, %v1722_v2 }
 0x208   : > { %v2474_v50 = vpop.f32.mrb[24].mxu0 }
 0x209   : > { %v2475_v42 = vpop.f32.mrb[25].mxu0 }
 0x20a   : > { %v2476_v16 = vadd.f32 %v2475_v42, %v2474_v50  ;;  %v2477_v29 = vpop.f32.mrb[26].mxu0 }
 0x20b   : > { %v2478_v45 = vpop.f32.mrb[27].mxu0 }
 0x20c   : > { %v2479_v4 = vadd.f32 %v2478_v45, %v2477_v29  ;;  %v2526_v38 = vpop.f32.mrb[16].mxu1  ;;  %v1743_v25 = vadd.f32 %v2476_v16, %v3815_v10 }
 0x20d   : > { %v2527_v26 = vpop.f32.mrb[17].mxu1 }
 0x20e   : > { %v2528_v43 = vadd.f32 %v2527_v26, %v2526_v38  ;;  %v2529_v54 = vpop.f32.mrb[18].mxu1  ;;  %v1746_v21 = vadd.f32 %v2479_v4, %v3815_v10 }
 0x20f   : > { %v2530_v0 = vpop.f32.mrb[19].mxu1 }
 0x210   : > { %v2531_v1 = vadd.f32 %v2530_v0, %v2529_v54  ;;  %v3846_v37 = vadd.f32 %v2528_v43, %v1727_v55 }
 0x211   : > { %v2480_v5 = vpop.f32.mrb[28].mxu0 }
 0x212   : > { %v2481_v47 = vpop.f32.mrb[29].mxu0  ;;  %v3848_v8 = vadd.f32 %v2531_v1, %v1730_v46 }
 0x213   : > { %v2482_v53 = vadd.f32 %v2481_v47, %v2480_v5  ;;  %v2483_v22 = vpop.f32.mrb[30].mxu0 }
 0x214   : > { %v2484_v7 = vpop.f32.mrb[31].mxu0 }
 0x215   : > { %v2485_v60 = vadd.f32 %v2484_v7, %v2483_v22  ;;  %v1751_v26 = vadd.f32 %v2482_v53, %v3815_v10 }
 0x217   : > { %v1754_v55 = vadd.f32 %v2485_v60, %v3815_v10 }
 0x218   : > { %v2532_v27 = vpop.f32.mrb[20].mxu1 }
 0x219   : > { %v2533_v44 = vpop.f32.mrb[21].mxu1 }
 0x21a   : > { %v2534_v9 = vadd.f32 %v2533_v44, %v2532_v27  ;;  %v2535_v12 = vpop.f32.mrb[22].mxu1 }
 0x21b   : > { %v2536_v40 = vpop.f32.mrb[23].mxu1 }
 0x21c   : > { %v2537_v48 = vadd.f32 %v2536_v40, %v2535_v12  ;;  %v3852_v35 = vadd.f32 %v2534_v9, %v1735_v62 }
 0x21e   : > { %v3854_v56 = vadd.f32 %v2537_v48, %v1738_v15 }
 0x220   : > { %v2538_v41 = vpop.f32.mrb[24].mxu1 }
 0x221   : > { %v2539_v3 = vpop.f32.mrb[25].mxu1 }
 0x222   : > { %v2540_v58 = vadd.f32 %v2539_v3, %v2538_v41  ;;  %v2541_v14 = vpop.f32.mrb[26].mxu1 }
 0x223   : > { %v2542_v52 = vpop.f32.mrb[27].mxu1  ;;  %v1888_v30 = vpop.f32.mrb[32].mxu0 }
 0x224   : > { %v2543_v61 = vadd.f32 %v2542_v52, %v2541_v14  ;;  %v1889_v33 = vadd.f32 %v1888_v30, %v3822_v51  ;;  %v1890_v63 = vpop.f32.mrb[33].mxu0  ;;  %v3860_v24 = vadd.f32 %v2540_v58, %v1743_v25 }
 0x225   : > { %v1891_v17 = vpop.f32.mrb[34].mxu0 }
 0x226   : > { %1951 = vst [vmem:[%s3862_s21] sm:$0xff] %v1889_v33  ;;  %v1892_v23 = vadd.f32 %v1891_v17, %v3824_v32  ;;  %v1893_v57 = vpop.f32.mrb[35].mxu0  ;;  %v3866_v31 = vadd.f32 %v2543_v61, %v1746_v21  ;;  %v1997_v13 = vmul.f32 %v1889_v33, %v1889_v33 }
 0x228   : > { %1952 = vst [vmem:[%s3862_s21 + $0x8] sm:$0xff] %v1892_v23  ;;  %v1973_v59 = vadd.f32 %v1892_v23, %v1889_v33  ;;  %v1998_v34 = vmul.f32 %v1892_v23, %v1892_v23 }
 0x22a   : > { %v2013_v51 = vadd.f32 %v1998_v34, %v1997_v13 }
 0x22b   : > { %v1896_v11 = vpop.f32.mrb[36].mxu0 }
 0x22c   : > { %v1897_v36 = vadd.f32 %v1896_v11, %v3828_v19  ;;  %v2544_v2 = vpop.f32.mrb[28].mxu1  ;;  %v1898_v39 = vpop.f32.mrb[37].mxu0 }
 0x22d   : > { %v2545_v50 = vpop.f32.mrb[29].mxu1  ;;  %v1899_v42 = vpop.f32.mrb[38].mxu0 }
 0x22e   : > { %1953 = vst [vmem:[%s3862_s21 + $0x10] sm:$0xff] %v1897_v36  ;;  %v1974_v16 = vadd.f32 %v1973_v59, %v1897_v36  ;;  %v1999_v29 = vmul.f32 %v1897_v36, %v1897_v36  ;;  %v2546_v32 = vadd.f32 %v2545_v50, %v2544_v2  ;;  %v1900_v45 = vadd.f32 %v1899_v42, %v3830_v6  ;;  %v2547_v4 = vpop.f32.mrb[30].mxu1  ;;  %v1901_v38 = vpop.f32.mrb[39].mxu0 }
 0x22f   : > { %v2548_v43 = vpop.f32.mrb[31].mxu1 }
 0x230   : > { %v2014_v19 = vadd.f32 %v2013_v51, %v1999_v29  ;;  %1954 = vst [vmem:[%s3862_s21 + $0x18] sm:$0xff] %v1900_v45  ;;  %v1975_v54 = vadd.f32 %v1974_v16, %v1900_v45  ;;  %v2000_v0 = vmul.f32 %v1900_v45, %v1900_v45  ;;  %v2549_v46 = vadd.f32 %v2548_v43, %v2547_v4 }
 0x231   : > { %v3875_v1 = vadd.f32 %v2546_v32, %v1751_v26 }
 0x232   : > { %v2015_v5 = vadd.f32 %v2014_v19, %v2000_v0  ;;  %v3877_v47 = vadd.f32 %v2549_v46, %v1754_v55 }
 0x233   : > { %v1904_v6 = vpop.f32.mrb[40].mxu0 }
 0x234   : > { %v1905_v22 = vadd.f32 %v1904_v6, %v3834_v18  ;;  %v1906_v53 = vpop.f32.mrb[41].mxu0  ;;  %v1920_v7 = vpop.f32.mrb[32].mxu1 }
 0x235   : > { %v1921_v10 = vadd.f32 %v1920_v7, %v3846_v37  ;;  %v1907_v60 = vpop.f32.mrb[42].mxu0  ;;  %v1922_v27 = vpop.f32.mrb[33].mxu1 }
 0x236   : > { %1955 = vst [vmem:[%s3862_s21 + $0x20] sm:$0xff] %v1905_v22  ;;  %v1976_v44 = vadd.f32 %v1975_v54, %v1905_v22  ;;  %v2001_v62 = vmul.f32 %v1905_v22, %v1905_v22  ;;  %v1908_v9 = vadd.f32 %v1907_v60, %v3836_v49  ;;  %v1909_v12 = vpop.f32.mrb[43].mxu0  ;;  %v1923_v40 = vpop.f32.mrb[34].mxu1 }
 0x237   : > { %1959 = vst [vmem:[%s3862_s21 + $0x40] sm:$0xff] %v1921_v10  ;;  %v1924_v15 = vadd.f32 %v1923_v40, %v3848_v8  ;;  %v1925_v18 = vpop.f32.mrb[35].mxu1 }
 0x238   : > { %v2016_v48 = vadd.f32 %v2015_v5, %v2001_v62  ;;  %1956 = vst [vmem:[%s3862_s21 + $0x28] sm:$0xff] %v1908_v9  ;;  %v1977_v41 = vadd.f32 %v1976_v44, %v1908_v9  ;;  %v2002_v3 = vmul.f32 %v1908_v9, %v1908_v9 }
 0x239   : > { %1960 = vst [vmem:[%s3862_s21 + $0x48] sm:$0xff] %v1924_v15  ;;  %v2006_v11 = vmul.f32 %v1924_v15, %v1924_v15 }
 0x23a   : > { %v2017_v37 = vadd.f32 %v2016_v48, %v2002_v3 }
 0x23b   : > { %v1912_v25 = vpop.f32.mrb[44].mxu0 }
 0x23c   : > { %v1913_v58 = vadd.f32 %v1912_v25, %v3840_v20  ;;  %v1914_v14 = vpop.f32.mrb[45].mxu0  ;;  %v1928_v49 = vpop.f32.mrb[36].mxu1 }
 0x23d   : > { %v1929_v52 = vadd.f32 %v1928_v49, %v3852_v35  ;;  %v1915_v30 = vpop.f32.mrb[46].mxu0  ;;  %v1930_v21 = vpop.f32.mrb[37].mxu1  ;;  %v2005_v35 = vmul.f32 %v1921_v10, %v1921_v10 }
 0x23e   : > { %1957 = vst [vmem:[%s3862_s21 + $0x30] sm:$0xff] %v1913_v58  ;;  %v1978_v8 = vadd.f32 %v1977_v41, %v1913_v58  ;;  %v2003_v61 = vmul.f32 %v1913_v58, %v1913_v58  ;;  %v1916_v33 = vadd.f32 %v1915_v30, %v3842_v28  ;;  %v1917_v63 = vpop.f32.mrb[47].mxu0  ;;  %v1931_v17 = vpop.f32.mrb[38].mxu1 }
 0x23f   : > { %1961 = vst [vmem:[%s3862_s21 + $0x50] sm:$0xff] %v1929_v52  ;;  %v1932_v23 = vadd.f32 %v1931_v17, %v3854_v56  ;;  %v1933_v57 = vpop.f32.mrb[39].mxu1  ;;  %v2007_v56 = vmul.f32 %v1929_v52, %v1929_v52 }
 0x240   : > { %v2018_v20 = vadd.f32 %v2017_v37, %v2003_v61  ;;  %1958 = vst [vmem:[%s3862_s21 + $0x38] sm:$0xff] %v1916_v33  ;;  %v1979_v13 = vadd.f32 %v1978_v8, %v1916_v33  ;;  %v2004_v59 = vmul.f32 %v1916_v33, %v1916_v33 }
 0x241   : > { %1962 = vst [vmem:[%s3862_s21 + $0x58] sm:$0xff] %v1932_v23  ;;  %v2008_v38 = vmul.f32 %v1932_v23, %v1932_v23 }
 0x242   : > { %v1980_v34 = vadd.f32 %v1979_v13, %v1921_v10  ;;  %v2019_v51 = vadd.f32 %v2018_v20, %v2004_v59 }
 0x244   : > { %v2020_v36 = vadd.f32 %v2019_v51, %v2005_v35  ;;  %v1981_v2 = vadd.f32 %v1980_v34, %v1924_v15  ;;  %v1936_v28 = vpop.f32.mrb[40].mxu1 }
 0x245   : > { %v1937_v39 = vadd.f32 %v1936_v28, %v3860_v24  ;;  %v1938_v50 = vpop.f32.mrb[41].mxu1 }
 0x246   : > { %v1982_v42 = vadd.f32 %v1981_v2, %v1929_v52  ;;  %v2021_v16 = vadd.f32 %v2020_v36, %v2006_v11  ;;  %v1939_v29 = vpop.f32.mrb[42].mxu1 }
 0x247   : > { %1963 = vst [vmem:[%s3862_s21 + $0x60] sm:$0xff] %v1937_v39  ;;  %v1940_v32 = vadd.f32 %v1939_v29, %v3866_v31  ;;  %v1941_v45 = vpop.f32.mrb[43].mxu1  ;;  %v2009_v19 = vmul.f32 %v1937_v39, %v1937_v39 }
 0x248   : > { %v1983_v4 = vadd.f32 %v1982_v42, %v1932_v23  ;;  %v2022_v26 = vadd.f32 %v2021_v16, %v2007_v56 }
 0x249   : > { %1964 = vst [vmem:[%s3862_s21 + $0x68] sm:$0xff] %v1940_v32  ;;  %v2010_v0 = vmul.f32 %v1940_v32, %v1940_v32 }
 0x24a   : > { %v2023_v55 = vadd.f32 %v2022_v26, %v2008_v38  ;;  %v1984_v43 = vadd.f32 %v1983_v4, %v1937_v39 }
 0x24c   : > { %v2024_v24 = vadd.f32 %v2023_v55, %v2009_v19  ;;  %v1985_v54 = vadd.f32 %v1984_v43, %v1940_v32  ;;  %v1944_v46 = vpop.f32.mrb[44].mxu1 }
 0x24d   : > { %v1945_v5 = vadd.f32 %v1944_v46, %v3875_v1  ;;  %v1946_v31 = vpop.f32.mrb[45].mxu1 }
 0x24e   : > { %v2025_v6 = vadd.f32 %v2024_v24, %v2010_v0  ;;  %v1947_v22 = vpop.f32.mrb[46].mxu1 }
 0x24f   : > { %1965 = vst [vmem:[%s3862_s21 + $0x70] sm:$0xff] %v1945_v5  ;;  %v1986_v53 = vadd.f32 %v1985_v54, %v1945_v5  ;;  %v2011_v7 = vmul.f32 %v1945_v5, %v1945_v5  ;;  %v1948_v10 = vadd.f32 %v1947_v22, %v3877_v47  ;;  %v1949_v1 = vpop.f32.mrb[47].mxu1 }
 0x251   : > { %v2026_v60 = vadd.f32 %v2025_v6, %v2011_v7  ;;  %1966 = vst [vmem:[%s3862_s21 + $0x78] sm:$0xff] %v1948_v10  ;;  %v1987_v27 = vadd.f32 %v1986_v53, %v1948_v10  ;;  %v2012_v44 = vmul.f32 %v1948_v10, %v1948_v10 }
 0x252   : > { %2885 = shalt.err (!%p2882_p2)
}
 0x253   : > { %s2886_s9 = scalar_lea.hbm %s3905_s25, 2048  ;;  %s2890_s21 = scalar_lea.hbm %s3997_s3, 4096 }
 0x254   : > { %p2887_p0 = scmp.ne.s32.totalorder %s3905_s25, %s2886_s9  ;;  %p2891_p6 = scmp.lt.u32.totalorder %s3905_s25, %s3997_s3 }
 0x255   : > { %p2892_p7 = scmp.lt.u32.totalorder %s2890_s21, %s2886_s9  ;;  %p2894_p8 = scmp.lt.u32.totalorder %s2886_s9, %s3905_s25 }
 0x256   : > { %p2888_p4 = pnand %p2887_p0, %p4015_p12 }
 0x257   : > { %p2893_p11 = por %p2892_p7, %p2891_p6 }
 0x258   : > { %p2889_p13 = pneg %p2888_p4 }
 0x259   : > { %p2895_p1 = por %p2894_p8, %p2893_p11 }
 0x25b   : > { %p2896_p10 = pnand %p2895_p1, %p2889_p13 }
 0x25d   : > { %2899 = shalt.err (!%p2896_p10)
}
 0x25e   : > { %s3008_s23 = smov 128   ;;  %s3009_s22 = smov 8   ;;  %v1988_v47 = vrot.slane %v1987_v27, 4  ;;  %v2027_v62 = vadd.f32 %v2026_v60, %v2012_v44  ;;  %v1972_v37 = vld [vmem:[%s3817_s8] sm:$0x1] }
 0x25f   : > { %2581 = dma.vmem_to_hbm [thread:$0]  (%p4015_p12), %s3907_s24, 2048, %s3905_s25, %s2037_s27, %s3008_s23, %s3008_s23, %s3009_s22  }
 0x260   : > { %v1989_v9 = vadd.f32 %v1988_v47, %v1987_v27  ;;  %v2028_v12 = vrot.slane %v2027_v62, 4  ;;  %v1996_v14 = vld [vmem:[%s3817_s8 + $0x1] sm:$0x1]  ;;  %s2418_s24 = sshll.u32 %s2982_s18, 5  ;;  %s2074_s25 = sshll.u32 %s3817_s8, 4  ;;  %s3946_s25 = int_to_ptr.vmem [resolvable:$true] %s2074_s25 }
 0x261   : > { %s3944_s14 = scalar_lea.hbm %s3998_s4, %s2418_s24  ;;  %s2042_s5 = scalar_lea.sflag [#allocation10], %s3229_s13 }
 0x262   : > { %v1990_v40 = vrot.slane %v1989_v9, 2  ;;  %v2029_v15 = vadd.f32 %v2028_v12, %v2027_v62  ;;  %s2900_s9 = scalar_lea.vmem %s3946_s25, 32  ;;  %s3010_s18 = smov [#allocation9]  }
 0x263   : > { %p2901_p3 = scmp.ne.s32.totalorder %s3946_s25, %s2900_s9  ;;  %s2904_s28 = sshll.u32 %s3010_s18, 4  ;;  %s2905_s28 = int_to_ptr.vmem [resolvable:$false] %s2904_s28 }
 0x264   : > { %v1991_v18 = vadd.f32 %v1990_v40, %v1989_v9  ;;  %v2030_v48 = vrot.slane %v2029_v15, 2  ;;  %s2906_s6 = scalar_lea.vmem %s2905_s28, 64  ;;  %p2907_p2 = scmp.lt.s32.totalorder %s3946_s25, %s2905_s28 }
 0x265   : > { %p2902_p5 = pnand %p2901_p3, %p4015_p12  ;;  %p2908_p0 = scmp.lt.s32.totalorder %s2906_s6, %s2900_s9 }
 0x266   : > { %v1992_v41 = vrot.slane %v1991_v18, 1  ;;  %v2031_v3 = vadd.f32 %v2030_v48, %v2029_v15 }
 0x267   : > { %p2903_p9 = pneg %p2902_p5  ;;  %p2909_p4 = por %p2908_p0, %p2907_p2 }
 0x268   : > { %v1993_v25 = vadd.f32 %v1992_v41, %v1991_v18  ;;  %v2032_v58 = vrot.slane %v2031_v3, 1 }
 0x269   : > { %p2910_p13 = pnand %p2909_p4, %p2903_p9 }
 0x26a   : > { %v1994_v49 = vadd.f32 %v1993_v25, %v1972_v37  ;;  %v2033_v52 = vadd.f32 %v2032_v58, %v2031_v3 }
 0x26c   : > { %1995 = vst [vmem:[%s3817_s8] sm:$0x1] %v1994_v49  ;;  %v2034_v30 = vadd.f32 %v2033_v52, %v1996_v14 }
 0x26e   : > { %2035 = vst [vmem:[%s3817_s8 + $0x1] sm:$0x1] %v2034_v30 }
 0x26f   : > { %2913 = shalt.err (!%p2910_p13)
}
 0x270   : > { %s2914_s13 = scalar_lea.hbm %s3944_s14, 32  ;;  %s2918_s29 = scalar_lea.hbm %s3998_s4, 64 }
 0x271   : > { %p2915_p6 = scmp.ne.s32.totalorder %s3944_s14, %s2914_s13  ;;  %p2919_p8 = scmp.lt.u32.totalorder %s3944_s14, %s3998_s4 }
 0x272   : > { %p2920_p1 = scmp.lt.u32.totalorder %s2918_s29, %s2914_s13  ;;  %p2922_p3 = scmp.lt.u32.totalorder %s2914_s13, %s3944_s14 }
 0x273   : > { %p2916_p7 = pnand %p2915_p6, %p4015_p12 }
 0x274   : > { %p2921_p10 = por %p2920_p1, %p2919_p8 }
 0x275   : > { %p2917_p11 = pneg %p2916_p7 }
 0x276   : > { %p2923_p5 = por %p2922_p3, %p2921_p10 }
 0x278   : > { %p2924_p9 = pnand %p2923_p5, %p2917_p11 }
 0x27a   : > { %2927 = shalt.err (!%p2924_p9)
}
 0x27b   : > { %2582 = dma.vmem_to_hbm [thread:$0]  (%p4015_p12), %s3946_s25, 32, %s3944_s14, %s2042_s5  }
 0x27c PF: > { %s2086_s22 = sand.u32 1, %s2970_s15   ;;  %p4016_p2 = scmp.ne.s32.totalorder %s4007_s26, 0 }
 0x27d   : > { %p4017_p0 = scmp.ge.s32.totalorder %s2990_s20, 2  ;;  %s2087_s24 = scalar_lea.sflag [#allocation4], %s2086_s22 }
 0x27f   : > { %p2597_p4 = pnand %p4017_p0, %p4016_p2 }
 0x281   : > { %2961 = dma.done.wait (!%p2597_p4), %s2087_s24, 2048  }
 0x282   : > { %2963 = vsyncadd (!%p2597_p4), %s2087_s24, 4294965248  ;;  %s2096_s27 = scalar_lea.sflag [#allocation10], %s2086_s22 }
 0x283   : > { %2965 = dma.done.wait (!%p2597_p4), %s2096_s27, 32  }
 0x284   : > { %2967 = vsyncadd (!%p2597_p4), %s2096_s27, 4294967264  ;;  %s25_s20 = sadd.s32 1, %s2990_s20   ;;  %s4018_s15 = smov %s2974_s16 }
 0x285   : > { %p22_p13 = scmp.ge.s32.totalorder %s25_s20, 4   ;;  %s4019_s16 = smov %s2978_s17 }
 0x286   : > { %s4020_s17 = smov %s3185_s12  ;;  %s4021_s18 = smov %s2986_s19 }
 0x287   : > { %s4022_s19 = smov %s4024_s7  ;;  %24 = sbr.rel (!%p22_p13) target bundleno = 9 (0x9), region = 109 }
 0x28e   :  { %2101 = vsyncpa [#allocation3], 1 }
 0x28f   :  { %2103 = vsyncpa [#allocation3 + $0x1], 1 }
 0x290   :  { %2104 = vsyncpa [#allocation6], 1 }
 0x291   :  { %2105 = vsyncpa [#allocation4], 1 }
 0x292   :  { %2107 = vsyncpa [#allocation4 + $0x1], 1 }
 0x293   :  { %2108 = vsyncpa [#allocation10], 1 }
 0x294   :  { %2110 = vsyncpa [#allocation10 + $0x1], 1 }

</bundles_post_ra>
